<compile_context>
chip_gen: v6e
topology: v6e:2x2x1
jax: 0.10.0
libtpu: 0.0.40
codegen_flags: <defaults>
</compile_context>

<pallas_src>
import functools
import numpy as np
import jax
import jax.numpy as jnp
from jax.experimental import pallas as pl
from jax.experimental.pallas import tpu as pltpu


def _eesp_down_kernel(x_ref, w1_ref, wdw_ref, w3_ref, b1_ref, a1_ref,
                      b2_ref, a2_ref, b3_ref, o_ref, taps_ref,
                      *, Hh, Wh, n, k, dils):
    """One image per grid step, everything at decimated (stride-2) resolution.

    x_ref   : (nIn, 4*Hh*Wh) input, phase-major lanes (phase = 2*(r%2)+(c%2),
                             then decimated row, then decimated col).
    w1_ref  : (n, nIn)       proj_1x1 grouped conv as dense block-diag, BN
                             scale s1 folded in.
    wdw_ref : (nOut, k*9*n)  depthwise dilated convs + HFF cumulative sums +
                             br_after_cat BN scale s2, folded into one matrix.
    w3_ref  : (nOut, nOut)   conv_1x1_exp grouped conv as dense block-diag,
                             BN scale s3 folded in.
    b*/a*   : (rows, 1)      folded BN biases / PReLU slopes.
    o_ref   : (nOut, Hh*Wh)  output block for this image.
    taps_ref: (k*9*n, Hh*Wh) VMEM scratch: im2col block of masked/rolled taps
                             consumed by the fused MXU matmul.
    """
    Tq = Hh * Wh

    # ---- proj_1x1 (CBR): one matmul over all 4 parity phases at once.
    out1 = jnp.dot(w1_ref[...], x_ref[...], preferred_element_type=jnp.float32)
    out1 = out1 + b1_ref[...]
    out1 = jnp.where(out1 >= 0.0, out1, a1_ref[...] * out1)          # (n, 4*Tq)

    # ---- decimated-plane (row, col) indices for the conv zero-padding masks.
    pos = jax.lax.broadcasted_iota(jnp.int32, (n, Tq), 1)
    if (Wh & (Wh - 1)) == 0:
        row = pos >> (Wh.bit_length() - 1)
        col = pos & (Wh - 1)
    else:  # TODO(synk): precompute row/col host-side for non-power-of-two W.
        row = pos // Wh
        col = pos % Wh

    # ---- build the im2col block: a tap at full-res offset (oy, ox) = parity
    #      phase (oy%2, ox%2) shifted by (qy, qx) in decimated coords.  Shifts
    #      are XLU lane rolls; conv zero-padding (which also kills circular
    #      wrap-around of the roll) is a hoisted row/col mask.
    for j, d in enumerate(dils):
        for t in range(9):
            ky, kx = t // 3, t % 3
            oy, ox = (ky - 1) * d, (kx - 1) * d
            py = oy % 2
            qy = (oy - py) // 2
            px = ox % 2
            qx = (ox - px) // 2
            ph = 2 * py + px
            base = out1[:, ph * Tq:(ph + 1) * Tq]        # lane-aligned view
            s = qy * Wh + qx
            tap = base if s == 0 else pltpu.roll(base, (-s) % Tq, axis=1)
            m = None
            if qy < 0:
                m = row >= -qy
            elif qy > 0:
                m = row < Hh - qy
            if qx < 0:
                mc = col >= -qx
                m = mc if m is None else (m & mc)
            elif qx > 0:
                mc = col < Wh - qx
                m = mc if m is None else (m & mc)
            if m is not None:                            # single select per tap
                tap = jnp.where(m, tap, 0.0)
            r0 = (j * 9 + t) * n
            taps_ref[r0:r0 + n, :] = tap

    # ---- depthwise convs + HFF + BN scale: one fused MXU matmul (K = k*9*n).
    cat = jnp.dot(wdw_ref[...], taps_ref[...],
                  preferred_element_type=jnp.float32)                # (nOut, Tq)
    cat = cat + b2_ref[...]
    cat = jnp.where(cat >= 0.0, cat, a2_ref[...] * cat)              # br_after_cat

    # ---- conv_1x1_exp (CB, scale folded).  stride==2 & 'avg' => EESP returns
    #      `expanded` directly (no residual add, no module_act PReLU).
    out = jnp.dot(w3_ref[...], cat, preferred_element_type=jnp.float32)
    o_ref[...] = out + b3_ref[...]


def downsampler_forward(x, w1f, wdwf, w3f, b1, a1, b2, a2, b3, *, n, k, dils):
    """DownSampler.forward == EESP(stride=2, down_method='avg') forward."""
    B, C, H, W = x.shape
    nOut = n * k
    assert H % 2 == 0 and W % 2 == 0, "even spatial dims expected for stride 2"
    Hh, Wh = H // 2, W // 2
    Tq = Hh * Wh

    # The only wrapper-side layout op: ONE XLA transpose producing the parity
    # phase split (r%2, c%2) with phase-major lanes.  The kernel output is
    # already in (B, nOut, Hh*Wh) layout, so no post-processing is needed.
    x_ph = x.astype(jnp.float32).reshape(B, C, Hh, 2, Wh, 2)
    x_ph = x_ph.transpose(0, 1, 3, 5, 2, 4).reshape(B, C, 4 * Tq)

    kernel = functools.partial(_eesp_down_kernel, Hh=Hh, Wh=Wh, n=n, k=k,
                               dils=tuple(int(d) for d in dils))

    def const(blk):          # whole-array operand, same block every grid step
        return pl.BlockSpec(blk, lambda b: (0,) * len(blk))

    out = pl.pallas_call(
        kernel,
        out_shape=jax.ShapeDtypeStruct((B, nOut, Tq), jnp.float32),
        grid=(B,),
        in_specs=[
            pl.BlockSpec((None, C, 4 * Tq), lambda b: (b, 0, 0)),   # x, per image
            const((n, C)),                                          # w1 (s1 folded)
            const((nOut, k * 9 * n)),                               # dw + HFF + s2
            const((nOut, nOut)),                                    # w3 (s3 folded)
            const((n, 1)), const((n, 1)),                           # b1, a1
            const((nOut, 1)), const((nOut, 1)),                     # b2, a2
            const((nOut, 1)),                                       # b3
        ],
        out_specs=pl.BlockSpec((None, nOut, Tq), lambda b: (b, 0, 0)),
        scratch_shapes=[pltpu.VMEM((k * 9 * n, Tq), jnp.float32)],
        compiler_params=pltpu.CompilerParams(
            dimension_semantics=("parallel",),     # v7x: shard batch over 2 TCs
            vmem_limit_bytes=32 * 1024 * 1024),
    )(x_ph, w1f, wdwf, w3f, b1, a1, b2, a2, b3)

    return out.reshape(B, nOut, Hh, Wh)


# ----------------------- plain-JAX glue & reference -----------------------

def _grouped_to_dense(w, groups):
    # w: (Cout, Cin//groups) weights of a grouped 1x1 conv (kernel dims squeezed)
    cout, cin_g = w.shape
    cout_g = cout // groups
    dense = jnp.zeros((cout, cin_g * groups), w.dtype)
    for g in range(groups):
        dense = dense.at[g * cout_g:(g + 1) * cout_g,
                         g * cin_g:(g + 1) * cin_g].set(
            w[g * cout_g:(g + 1) * cout_g])
    return dense


def _bn_fold(gamma, beta, mean, var, eps=1e-5):
    scale = gamma / jnp.sqrt(var + eps)
    return scale, beta - mean * scale


def _dw_hff_weight(wdw_full, s2, n, k):
    """(nOut, k*9*n) matrix implementing the k depthwise dilated 3x3 convs,
    the hierarchical feature fusion cumulative sums (branch b = sum_{j<=b}
    conv_j; HFF is linear) and the br_after_cat BN scale, as a single
    contraction over the stacked taps ordered (branch j, tap t, channel c)."""
    w = wdw_full.reshape(k, n, 9)                        # (j, c, t)
    tri = jnp.tril(jnp.ones((k, k), w.dtype))            # (b, j): j <= b
    eye = jnp.eye(n, dtype=w.dtype)
    big = jnp.einsum('bj,jct,ce->bcjte', tri, w, eye)    # (b, c, j, t, e)
    return s2[:, None] * big.reshape(k * n, k * 9 * n)


def downsampler_reference(x, w1, s1, b1, a1, wdw_full, s2, b2, a2,
                          w3, s3, b3, dils, n):
    hi = jax.lax.Precision.HIGHEST
    out1 = jnp.einsum('oc,bchw->bohw', w1, x, precision=hi)
    out1 = out1 * s1[None, :, None, None] + b1[None, :, None, None]
    out1 = jnp.where(out1 >= 0, out1, a1[None, :, None, None] * out1)
    prev = None
    branches = []
    for bidx, d in enumerate(dils):
        d = int(d)
        wb = wdw_full[bidx][:, None, :, :]              # (n,1,3,3) depthwise
        y = jax.lax.conv_general_dilated(
            out1, wb, window_strides=(2, 2), padding=((d, d), (d, d)),
            rhs_dilation=(d, d), dimension_numbers=('NCHW', 'OIHW', 'NCHW'),
            feature_group_count=n, precision=hi)
        if prev is not None:
            y = y + prev
        prev = y
        branches.append(y)
    cat = jnp.concatenate(branches, axis=1)
    cat = cat * s2[None, :, None, None] + b2[None, :, None, None]
    cat = jnp.where(cat >= 0, cat, a2[None, :, None, None] * cat)
    exp = jnp.einsum('oc,bchw->bohw', w3, cat, precision=hi)
    exp = exp * s3[None, :, None, None] + b3[None, :, None, None]
    # stride == 2 and down_method == 'avg' -> EESP returns `expanded` directly;
    # DownSampler.forward returns it unchanged.
    return exp


if __name__ == "__main__":
    # DownSampler defaults: EESP(nin, nout, stride=2, k=4, r_lim=9, 'avg')
    nIn, nOut = 16, 32
    k = 4
    n = nOut // k            # 8 -> fills all 8 f32 sublanes in the tap stage
    r_lim = 9
    B, H, W = 2, 32, 32      # per-image decimated plane = 16*16 = 256 lanes

    map_receptive_ksize = {3: 1, 5: 2, 7: 3, 9: 4, 11: 5, 13: 6, 15: 7, 17: 8}
    k_sizes = sorted([(3 + 2 * i) if (3 + 2 * i) <= r_lim else 3 for i in range(k)])
    dils = tuple(map_receptive_ksize[ks] for ks in k_sizes)   # (1, 2, 3, 4)

    key = jax.random.PRNGKey(0)
    ks = jax.random.split(key, 20)
    u = lambda kk, shp, lo, hi: jax.random.uniform(kk, shp, jnp.float32, lo, hi)

    # proj_1x1 (CBR): grouped 1x1 conv (groups=k) + BN + PReLU  -> n channels
    w_proj = jax.random.normal(ks[0], (n, nIn // k), jnp.float32) * 0.3
    w1 = _grouped_to_dense(w_proj, k)                        # (n, nIn)
    s1, b1 = _bn_fold(u(ks[1], (n,), 0.5, 1.5), u(ks[2], (n,), -0.2, 0.2),
                      u(ks[3], (n,), -0.2, 0.2), u(ks[4], (n,), 0.5, 1.5))
    a1 = u(ks[5], (n,), 0.1, 0.3)

    # spp_dw: k depthwise dilated 3x3 convs (stride 2)
    wdw_full = jax.random.normal(ks[6], (k, n, 3, 3), jnp.float32) * 0.3

    # br_after_cat (BR): BN + PReLU over nOut channels
    s2, b2 = _bn_fold(u(ks[7], (nOut,), 0.5, 1.5), u(ks[8], (nOut,), -0.2, 0.2),
                      u(ks[9], (nOut,), -0.2, 0.2), u(ks[10], (nOut,), 0.5, 1.5))
    a2 = u(ks[11], (nOut,), 0.1, 0.3)

    # conv_1x1_exp (CB): grouped 1x1 conv + BN (no activation on this path)
    w_exp = jax.random.normal(ks[12], (nOut, nOut // k), jnp.float32) * 0.3
    w3 = _grouped_to_dense(w_exp, k)                         # (nOut, nOut)
    s3, b3 = _bn_fold(u(ks[13], (nOut,), 0.5, 1.5), u(ks[14], (nOut,), -0.2, 0.2),
                      u(ks[15], (nOut,), -0.2, 0.2), u(ks[16], (nOut,), 0.5, 1.5))

    # Fold BN scales into the matmul weights; fold HFF + s2 into the dw matrix.
    w1f = s1[:, None] * w1                                   # (n, nIn)
    w3f = s3[:, None] * w3                                   # (nOut, nOut)
    wdwf = _dw_hff_weight(wdw_full, s2, n, k)                # (nOut, k*9*n)

    x = jax.random.normal(ks[17], (B, nIn, H, W), jnp.float32)

    out = downsampler_forward(x, w1f, wdwf, w3f,
                              b1[:, None], a1[:, None],
                              b2[:, None], a2[:, None], b3[:, None],
                              n=n, k=k, dils=dils)
    out = jax.block_until_ready(out)

    ref = downsampler_reference(x, w1, s1, b1, a1, wdw_full, s2, b2, a2,
                                w3, s3, b3, dils, n)
    ref = jax.block_until_ready(ref)

    assert out.shape == ref.shape == (B, nOut, H // 2, W // 2)
    if not np.allclose(np.asarray(out), np.asarray(ref), rtol=5e-3, atol=5e-3):
        raise AssertionError("Pallas DownSampler output does not match JAX reference")
    print("KERNEL_OK")
</pallas_src>

<mosaic_0001>
module attributes {stable_mosaic.version = 11 : i64} {
  func.func @_eesp_down_kernel(%arg0: i32, %arg1: memref<1x16x1024xf32, #tpu.memory_space<vmem>>, %arg2: memref<8x16xf32, #tpu.memory_space<vmem>>, %arg3: memref<32x288xf32, #tpu.memory_space<vmem>>, %arg4: memref<32x32xf32, #tpu.memory_space<vmem>>, %arg5: memref<8x1xf32, #tpu.memory_space<vmem>>, %arg6: memref<8x1xf32, #tpu.memory_space<vmem>>, %arg7: memref<32x1xf32, #tpu.memory_space<vmem>>, %arg8: memref<32x1xf32, #tpu.memory_space<vmem>>, %arg9: memref<32x1xf32, #tpu.memory_space<vmem>>, %arg10: memref<1x32x256xf32, #tpu.memory_space<vmem>>, %arg11: memref<288x256xf32, #tpu.memory_space<vmem>>) attributes {dimension_semantics = [#tpu.dimension_semantics<parallel>], iteration_bounds = array<i64: 2>, scalar_prefetch = 0 : i64, scratch_operands = 1 : i64, tpu.core_type = #tpu.core_type<tc>, window_params = [{transform_indices = @transform_0, window_bounds = array<i64: 1, 16, 1024>}, {pipeline_mode = #tpu.pipeline_mode<synchronous>, transform_indices = @transform_1, window_bounds = array<i64: 8, 16>}, {pipeline_mode = #tpu.pipeline_mode<synchronous>, transform_indices = @transform_2, window_bounds = array<i64: 32, 288>}, {pipeline_mode = #tpu.pipeline_mode<synchronous>, transform_indices = @transform_3, window_bounds = array<i64: 32, 32>}, {pipeline_mode = #tpu.pipeline_mode<synchronous>, transform_indices = @transform_4, window_bounds = array<i64: 8, 1>}, {pipeline_mode = #tpu.pipeline_mode<synchronous>, transform_indices = @transform_5, window_bounds = array<i64: 8, 1>}, {pipeline_mode = #tpu.pipeline_mode<synchronous>, transform_indices = @transform_6, window_bounds = array<i64: 32, 1>}, {pipeline_mode = #tpu.pipeline_mode<synchronous>, transform_indices = @transform_7, window_bounds = array<i64: 32, 1>}, {pipeline_mode = #tpu.pipeline_mode<synchronous>, transform_indices = @transform_8, window_bounds = array<i64: 32, 1>}, {transform_indices = @transform_9, window_bounds = array<i64: 1, 32, 256>}]} {
    %c0 = arith.constant 0 : index
    %c0_0 = arith.constant 0 : index
    %0 = vector.load %arg2[%c0, %c0_0] : memref<8x16xf32, #tpu.memory_space<vmem>>, vector<8x16xf32>
    %c0_1 = arith.constant 0 : index
    %c0_2 = arith.constant 0 : index
    %c0_3 = arith.constant 0 : index
    %1 = vector.load %arg1[%c0_1, %c0_2, %c0_3] : memref<1x16x1024xf32, #tpu.memory_space<vmem>>, vector<1x16x1024xf32>
    %2 = vector.shape_cast %1 : vector<1x16x1024xf32> to vector<16x1024xf32>
    %cst = arith.constant dense<0.000000e+00> : vector<8x1024xf32>
    %3 = tpu.matmul %0, %2, %cst {dimension_numbers = #tpu.dot_dimension_numbers<[1], [0], [0], [1], [0, 0, 1, 1], [], []>} : vector<8x16xf32>, vector<16x1024xf32>, vector<8x1024xf32> -> vector<8x1024xf32>
    %c0_4 = arith.constant 0 : index
    %c0_5 = arith.constant 0 : index
    %4 = vector.load %arg5[%c0_4, %c0_5] : memref<8x1xf32, #tpu.memory_space<vmem>>, vector<8x1xf32>
    %5 = vector.broadcast %4 : vector<8x1xf32> to vector<8x1024xf32>
    %6 = arith.addf %3, %5 : vector<8x1024xf32>
    %cst_6 = arith.constant 0.000000e+00 : f32
    %7 = vector.broadcast %cst_6 : f32 to vector<8x1024xf32>
    %8 = arith.cmpf oge, %6, %7 : vector<8x1024xf32>
    %c0_7 = arith.constant 0 : index
    %c0_8 = arith.constant 0 : index
    %9 = vector.load %arg6[%c0_7, %c0_8] : memref<8x1xf32, #tpu.memory_space<vmem>>, vector<8x1xf32>
    %10 = vector.broadcast %9 : vector<8x1xf32> to vector<8x1024xf32>
    %11 = arith.mulf %10, %6 : vector<8x1024xf32>
    %12 = arith.select %8, %6, %11 : vector<8x1024xi1>, vector<8x1024xf32>
    %13 = tpu.iota {dimensions = array<i32: 1>} : vector<8x256xi32>
    %c4_i32 = arith.constant 4 : i32
    %14 = vector.broadcast %c4_i32 : i32 to vector<8x256xi32>
    %15 = arith.shrsi %13, %14 : vector<8x256xi32>
    %c15_i32 = arith.constant 15 : i32
    %16 = vector.broadcast %c15_i32 : i32 to vector<8x256xi32>
    %17 = arith.andi %13, %16 : vector<8x256xi32>
    %18 = vector.extract_strided_slice %12 {offsets = [0, 768], sizes = [8, 256], strides = [1, 1]} : vector<8x1024xf32> to vector<8x256xf32>
    %c17_i32 = arith.constant 17 : i32
    %19 = tpu.dynamic_rotate %18 by %c17_i32 dim 1 : vector<8x256xf32>, i32 -> vector<8x256xf32>
    %c1_i32 = arith.constant 1 : i32
    %20 = vector.broadcast %c1_i32 : i32 to vector<8x256xi32>
    %21 = arith.cmpi sge, %15, %20 : vector<8x256xi32>
    %c1_i32_9 = arith.constant 1 : i32
    %22 = vector.broadcast %c1_i32_9 : i32 to vector<8x256xi32>
    %23 = arith.cmpi sge, %17, %22 : vector<8x256xi32>
    %24 = arith.andi %21, %23 : vector<8x256xi1>
    %cst_10 = arith.constant 0.000000e+00 : f32
    %25 = vector.broadcast %cst_10 : f32 to vector<8x256xf32>
    %26 = arith.select %24, %19, %25 : vector<8x256xi1>, vector<8x256xf32>
    %c0_11 = arith.constant 0 : index
    %c0_12 = arith.constant 0 : index
    %27 = vector.load %arg11[%c0_11, %c0_12] : memref<288x256xf32, #tpu.memory_space<vmem>>, vector<8x256xf32>
    tpu.vector_store %arg11[%c0_11, %c0_12], %26 {strides = array<i32>} : memref<288x256xf32, #tpu.memory_space<vmem>>, vector<8x256xf32>,
    %28 = vector.extract_strided_slice %12 {offsets = [0, 512], sizes = [8, 256], strides = [1, 1]} : vector<8x1024xf32> to vector<8x256xf32>
    %c16_i32 = arith.constant 16 : i32
    %29 = tpu.dynamic_rotate %28 by %c16_i32 dim 1 : vector<8x256xf32>, i32 -> vector<8x256xf32>
    %c1_i32_13 = arith.constant 1 : i32
    %30 = vector.broadcast %c1_i32_13 : i32 to vector<8x256xi32>
    %31 = arith.cmpi sge, %15, %30 : vector<8x256xi32>
    %cst_14 = arith.constant 0.000000e+00 : f32
    %32 = vector.broadcast %cst_14 : f32 to vector<8x256xf32>
    %33 = arith.select %31, %29, %32 : vector<8x256xi1>, vector<8x256xf32>
    %c8 = arith.constant 8 : index
    %c0_15 = arith.constant 0 : index
    %34 = vector.load %arg11[%c8, %c0_15] : memref<288x256xf32, #tpu.memory_space<vmem>>, vector<8x256xf32>
    tpu.vector_store %arg11[%c8, %c0_15], %33 {strides = array<i32>} : memref<288x256xf32, #tpu.memory_space<vmem>>, vector<8x256xf32>,
    %35 = vector.extract_strided_slice %12 {offsets = [0, 768], sizes = [8, 256], strides = [1, 1]} : vector<8x1024xf32> to vector<8x256xf32>
    %c16_i32_16 = arith.constant 16 : i32
    %36 = tpu.dynamic_rotate %35 by %c16_i32_16 dim 1 : vector<8x256xf32>, i32 -> vector<8x256xf32>
    %c1_i32_17 = arith.constant 1 : i32
    %37 = vector.broadcast %c1_i32_17 : i32 to vector<8x256xi32>
    %38 = arith.cmpi sge, %15, %37 : vector<8x256xi32>
    %cst_18 = arith.constant 0.000000e+00 : f32
    %39 = vector.broadcast %cst_18 : f32 to vector<8x256xf32>
    %40 = arith.select %38, %36, %39 : vector<8x256xi1>, vector<8x256xf32>
    %c16 = arith.constant 16 : index
    %c0_19 = arith.constant 0 : index
    %41 = vector.load %arg11[%c16, %c0_19] : memref<288x256xf32, #tpu.memory_space<vmem>>, vector<8x256xf32>
    tpu.vector_store %arg11[%c16, %c0_19], %40 {strides = array<i32>} : memref<288x256xf32, #tpu.memory_space<vmem>>, vector<8x256xf32>,
    %42 = vector.extract_strided_slice %12 {offsets = [0, 256], sizes = [8, 256], strides = [1, 1]} : vector<8x1024xf32> to vector<8x256xf32>
    %c1_i32_20 = arith.constant 1 : i32
    %43 = tpu.dynamic_rotate %42 by %c1_i32_20 dim 1 : vector<8x256xf32>, i32 -> vector<8x256xf32>
    %c1_i32_21 = arith.constant 1 : i32
    %44 = vector.broadcast %c1_i32_21 : i32 to vector<8x256xi32>
    %45 = arith.cmpi sge, %17, %44 : vector<8x256xi32>
    %cst_22 = arith.constant 0.000000e+00 : f32
    %46 = vector.broadcast %cst_22 : f32 to vector<8x256xf32>
    %47 = arith.select %45, %43, %46 : vector<8x256xi1>, vector<8x256xf32>
    %c24 = arith.constant 24 : index
    %c0_23 = arith.constant 0 : index
    %48 = vector.load %arg11[%c24, %c0_23] : memref<288x256xf32, #tpu.memory_space<vmem>>, vector<8x256xf32>
    tpu.vector_store %arg11[%c24, %c0_23], %47 {strides = array<i32>} : memref<288x256xf32, #tpu.memory_space<vmem>>, vector<8x256xf32>,
    %49 = vector.extract_strided_slice %12 {offsets = [0, 0], sizes = [8, 256], strides = [1, 1]} : vector<8x1024xf32> to vector<8x256xf32>
    %c32 = arith.constant 32 : index
    %c0_24 = arith.constant 0 : index
    %50 = vector.load %arg11[%c32, %c0_24] : memref<288x256xf32, #tpu.memory_space<vmem>>, vector<8x256xf32>
    tpu.vector_store %arg11[%c32, %c0_24], %49 {strides = array<i32>} : memref<288x256xf32, #tpu.memory_space<vmem>>, vector<8x256xf32>,
    %51 = vector.extract_strided_slice %12 {offsets = [0, 256], sizes = [8, 256], strides = [1, 1]} : vector<8x1024xf32> to vector<8x256xf32>
    %c40 = arith.constant 40 : index
    %c0_25 = arith.constant 0 : index
    %52 = vector.load %arg11[%c40, %c0_25] : memref<288x256xf32, #tpu.memory_space<vmem>>, vector<8x256xf32>
    tpu.vector_store %arg11[%c40, %c0_25], %51 {strides = array<i32>} : memref<288x256xf32, #tpu.memory_space<vmem>>, vector<8x256xf32>,
    %53 = vector.extract_strided_slice %12 {offsets = [0, 768], sizes = [8, 256], strides = [1, 1]} : vector<8x1024xf32> to vector<8x256xf32>
    %c1_i32_26 = arith.constant 1 : i32
    %54 = tpu.dynamic_rotate %53 by %c1_i32_26 dim 1 : vector<8x256xf32>, i32 -> vector<8x256xf32>
    %c1_i32_27 = arith.constant 1 : i32
    %55 = vector.broadcast %c1_i32_27 : i32 to vector<8x256xi32>
    %56 = arith.cmpi sge, %17, %55 : vector<8x256xi32>
    %cst_28 = arith.constant 0.000000e+00 : f32
    %57 = vector.broadcast %cst_28 : f32 to vector<8x256xf32>
    %58 = arith.select %56, %54, %57 : vector<8x256xi1>, vector<8x256xf32>
    %c48 = arith.constant 48 : index
    %c0_29 = arith.constant 0 : index
    %59 = vector.load %arg11[%c48, %c0_29] : memref<288x256xf32, #tpu.memory_space<vmem>>, vector<8x256xf32>
    tpu.vector_store %arg11[%c48, %c0_29], %58 {strides = array<i32>} : memref<288x256xf32, #tpu.memory_space<vmem>>, vector<8x256xf32>,
    %60 = vector.extract_strided_slice %12 {offsets = [0, 512], sizes = [8, 256], strides = [1, 1]} : vector<8x1024xf32> to vector<8x256xf32>
    %c56 = arith.constant 56 : index
    %c0_30 = arith.constant 0 : index
    %61 = vector.load %arg11[%c56, %c0_30] : memref<288x256xf32, #tpu.memory_space<vmem>>, vector<8x256xf32>
    tpu.vector_store %arg11[%c56, %c0_30], %60 {strides = array<i32>} : memref<288x256xf32, #tpu.memory_space<vmem>>, vector<8x256xf32>,
    %62 = vector.extract_strided_slice %12 {offsets = [0, 768], sizes = [8, 256], strides = [1, 1]} : vector<8x1024xf32> to vector<8x256xf32>
    %c64 = arith.constant 64 : index
    %c0_31 = arith.constant 0 : index
    %63 = vector.load %arg11[%c64, %c0_31] : memref<288x256xf32, #tpu.memory_space<vmem>>, vector<8x256xf32>
    tpu.vector_store %arg11[%c64, %c0_31], %62 {strides = array<i32>} : memref<288x256xf32, #tpu.memory_space<vmem>>, vector<8x256xf32>,
    %64 = vector.extract_strided_slice %12 {offsets = [0, 0], sizes = [8, 256], strides = [1, 1]} : vector<8x1024xf32> to vector<8x256xf32>
    %c17_i32_32 = arith.constant 17 : i32
    %65 = tpu.dynamic_rotate %64 by %c17_i32_32 dim 1 : vector<8x256xf32>, i32 -> vector<8x256xf32>
    %c1_i32_33 = arith.constant 1 : i32
    %66 = vector.broadcast %c1_i32_33 : i32 to vector<8x256xi32>
    %67 = arith.cmpi sge, %15, %66 : vector<8x256xi32>
    %c1_i32_34 = arith.constant 1 : i32
    %68 = vector.broadcast %c1_i32_34 : i32 to vector<8x256xi32>
    %69 = arith.cmpi sge, %17, %68 : vector<8x256xi32>
    %70 = arith.andi %67, %69 : vector<8x256xi1>
    %cst_35 = arith.constant 0.000000e+00 : f32
    %71 = vector.broadcast %cst_35 : f32 to vector<8x256xf32>
    %72 = arith.select %70, %65, %71 : vector<8x256xi1>, vector<8x256xf32>
    %c72 = arith.constant 72 : index
    %c0_36 = arith.constant 0 : index
    %73 = vector.load %arg11[%c72, %c0_36] : memref<288x256xf32, #tpu.memory_space<vmem>>, vector<8x256xf32>
    tpu.vector_store %arg11[%c72, %c0_36], %72 {strides = array<i32>} : memref<288x256xf32, #tpu.memory_space<vmem>>, vector<8x256xf32>,
    %74 = vector.extract_strided_slice %12 {offsets = [0, 0], sizes = [8, 256], strides = [1, 1]} : vector<8x1024xf32> to vector<8x256xf32>
    %c16_i32_37 = arith.constant 16 : i32
    %75 = tpu.dynamic_rotate %74 by %c16_i32_37 dim 1 : vector<8x256xf32>, i32 -> vector<8x256xf32>
    %c1_i32_38 = arith.constant 1 : i32
    %76 = vector.broadcast %c1_i32_38 : i32 to vector<8x256xi32>
    %77 = arith.cmpi sge, %15, %76 : vector<8x256xi32>
    %cst_39 = arith.constant 0.000000e+00 : f32
    %78 = vector.broadcast %cst_39 : f32 to vector<8x256xf32>
    %79 = arith.select %77, %75, %78 : vector<8x256xi1>, vector<8x256xf32>
    %c80 = arith.constant 80 : index
    %c0_40 = arith.constant 0 : index
    %80 = vector.load %arg11[%c80, %c0_40] : memref<288x256xf32, #tpu.memory_space<vmem>>, vector<8x256xf32>
    tpu.vector_store %arg11[%c80, %c0_40], %79 {strides = array<i32>} : memref<288x256xf32, #tpu.memory_space<vmem>>, vector<8x256xf32>,
    %81 = vector.extract_strided_slice %12 {offsets = [0, 0], sizes = [8, 256], strides = [1, 1]} : vector<8x1024xf32> to vector<8x256xf32>
    %c15_i32_41 = arith.constant 15 : i32
    %82 = tpu.dynamic_rotate %81 by %c15_i32_41 dim 1 : vector<8x256xf32>, i32 -> vector<8x256xf32>
    %c1_i32_42 = arith.constant 1 : i32
    %83 = vector.broadcast %c1_i32_42 : i32 to vector<8x256xi32>
    %84 = arith.cmpi sge, %15, %83 : vector<8x256xi32>
    %c15_i32_43 = arith.constant 15 : i32
    %85 = vector.broadcast %c15_i32_43 : i32 to vector<8x256xi32>
    %86 = arith.cmpi slt, %17, %85 : vector<8x256xi32>
    %87 = arith.andi %84, %86 : vector<8x256xi1>
    %cst_44 = arith.constant 0.000000e+00 : f32
    %88 = vector.broadcast %cst_44 : f32 to vector<8x256xf32>
    %89 = arith.select %87, %82, %88 : vector<8x256xi1>, vector<8x256xf32>
    %c88 = arith.constant 88 : index
    %c0_45 = arith.constant 0 : index
    %90 = vector.load %arg11[%c88, %c0_45] : memref<288x256xf32, #tpu.memory_space<vmem>>, vector<8x256xf32>
    tpu.vector_store %arg11[%c88, %c0_45], %89 {strides = array<i32>} : memref<288x256xf32, #tpu.memory_space<vmem>>, vector<8x256xf32>,
    %91 = vector.extract_strided_slice %12 {offsets = [0, 0], sizes = [8, 256], strides = [1, 1]} : vector<8x1024xf32> to vector<8x256xf32>
    %c1_i32_46 = arith.constant 1 : i32
    %92 = tpu.dynamic_rotate %91 by %c1_i32_46 dim 1 : vector<8x256xf32>, i32 -> vector<8x256xf32>
    %c1_i32_47 = arith.constant 1 : i32
    %93 = vector.broadcast %c1_i32_47 : i32 to vector<8x256xi32>
    %94 = arith.cmpi sge, %17, %93 : vector<8x256xi32>
    %cst_48 = arith.constant 0.000000e+00 : f32
    %95 = vector.broadcast %cst_48 : f32 to vector<8x256xf32>
    %96 = arith.select %94, %92, %95 : vector<8x256xi1>, vector<8x256xf32>
    %c96 = arith.constant 96 : index
    %c0_49 = arith.constant 0 : index
    %97 = vector.load %arg11[%c96, %c0_49] : memref<288x256xf32, #tpu.memory_space<vmem>>, vector<8x256xf32>
    tpu.vector_store %arg11[%c96, %c0_49], %96 {strides = array<i32>} : memref<288x256xf32, #tpu.memory_space<vmem>>, vector<8x256xf32>,
    %98 = vector.extract_strided_slice %12 {offsets = [0, 0], sizes = [8, 256], strides = [1, 1]} : vector<8x1024xf32> to vector<8x256xf32>
    %c104 = arith.constant 104 : index
    %c0_50 = arith.constant 0 : index
    %99 = vector.load %arg11[%c104, %c0_50] : memref<288x256xf32, #tpu.memory_space<vmem>>, vector<8x256xf32>
    tpu.vector_store %arg11[%c104, %c0_50], %98 {strides = array<i32>} : memref<288x256xf32, #tpu.memory_space<vmem>>, vector<8x256xf32>,
    %100 = vector.extract_strided_slice %12 {offsets = [0, 0], sizes = [8, 256], strides = [1, 1]} : vector<8x1024xf32> to vector<8x256xf32>
    %c255_i32 = arith.constant 255 : i32
    %101 = tpu.dynamic_rotate %100 by %c255_i32 dim 1 : vector<8x256xf32>, i32 -> vector<8x256xf32>
    %c15_i32_51 = arith.constant 15 : i32
    %102 = vector.broadcast %c15_i32_51 : i32 to vector<8x256xi32>
    %103 = arith.cmpi slt, %17, %102 : vector<8x256xi32>
    %cst_52 = arith.constant 0.000000e+00 : f32
    %104 = vector.broadcast %cst_52 : f32 to vector<8x256xf32>
    %105 = arith.select %103, %101, %104 : vector<8x256xi1>, vector<8x256xf32>
    %c112 = arith.constant 112 : index
    %c0_53 = arith.constant 0 : index
    %106 = vector.load %arg11[%c112, %c0_53] : memref<288x256xf32, #tpu.memory_space<vmem>>, vector<8x256xf32>
    tpu.vector_store %arg11[%c112, %c0_53], %105 {strides = array<i32>} : memref<288x256xf32, #tpu.memory_space<vmem>>, vector<8x256xf32>,
    %107 = vector.extract_strided_slice %12 {offsets = [0, 0], sizes = [8, 256], strides = [1, 1]} : vector<8x1024xf32> to vector<8x256xf32>
    %c241_i32 = arith.constant 241 : i32
    %108 = tpu.dynamic_rotate %107 by %c241_i32 dim 1 : vector<8x256xf32>, i32 -> vector<8x256xf32>
    %c15_i32_54 = arith.constant 15 : i32
    %109 = vector.broadcast %c15_i32_54 : i32 to vector<8x256xi32>
    %110 = arith.cmpi slt, %15, %109 : vector<8x256xi32>
    %c1_i32_55 = arith.constant 1 : i32
    %111 = vector.broadcast %c1_i32_55 : i32 to vector<8x256xi32>
    %112 = arith.cmpi sge, %17, %111 : vector<8x256xi32>
    %113 = arith.andi %110, %112 : vector<8x256xi1>
    %cst_56 = arith.constant 0.000000e+00 : f32
    %114 = vector.broadcast %cst_56 : f32 to vector<8x256xf32>
    %115 = arith.select %113, %108, %114 : vector<8x256xi1>, vector<8x256xf32>
    %c120 = arith.constant 120 : index
    %c0_57 = arith.constant 0 : index
    %116 = vector.load %arg11[%c120, %c0_57] : memref<288x256xf32, #tpu.memory_space<vmem>>, vector<8x256xf32>
    tpu.vector_store %arg11[%c120, %c0_57], %115 {strides = array<i32>} : memref<288x256xf32, #tpu.memory_space<vmem>>, vector<8x256xf32>,
    %117 = vector.extract_strided_slice %12 {offsets = [0, 0], sizes = [8, 256], strides = [1, 1]} : vector<8x1024xf32> to vector<8x256xf32>
    %c240_i32 = arith.constant 240 : i32
    %118 = tpu.dynamic_rotate %117 by %c240_i32 dim 1 : vector<8x256xf32>, i32 -> vector<8x256xf32>
    %c15_i32_58 = arith.constant 15 : i32
    %119 = vector.broadcast %c15_i32_58 : i32 to vector<8x256xi32>
    %120 = arith.cmpi slt, %15, %119 : vector<8x256xi32>
    %cst_59 = arith.constant 0.000000e+00 : f32
    %121 = vector.broadcast %cst_59 : f32 to vector<8x256xf32>
    %122 = arith.select %120, %118, %121 : vector<8x256xi1>, vector<8x256xf32>
    %c128 = arith.constant 128 : index
    %c0_60 = arith.constant 0 : index
    %123 = vector.load %arg11[%c128, %c0_60] : memref<288x256xf32, #tpu.memory_space<vmem>>, vector<8x256xf32>
    tpu.vector_store %arg11[%c128, %c0_60], %122 {strides = array<i32>} : memref<288x256xf32, #tpu.memory_space<vmem>>, vector<8x256xf32>,
    %124 = vector.extract_strided_slice %12 {offsets = [0, 0], sizes = [8, 256], strides = [1, 1]} : vector<8x1024xf32> to vector<8x256xf32>
    %c239_i32 = arith.constant 239 : i32
    %125 = tpu.dynamic_rotate %124 by %c239_i32 dim 1 : vector<8x256xf32>, i32 -> vector<8x256xf32>
    %c15_i32_61 = arith.constant 15 : i32
    %126 = vector.broadcast %c15_i32_61 : i32 to vector<8x256xi32>
    %127 = arith.cmpi slt, %15, %126 : vector<8x256xi32>
    %c15_i32_62 = arith.constant 15 : i32
    %128 = vector.broadcast %c15_i32_62 : i32 to vector<8x256xi32>
    %129 = arith.cmpi slt, %17, %128 : vector<8x256xi32>
    %130 = arith.andi %127, %129 : vector<8x256xi1>
    %cst_63 = arith.constant 0.000000e+00 : f32
    %131 = vector.broadcast %cst_63 : f32 to vector<8x256xf32>
    %132 = arith.select %130, %125, %131 : vector<8x256xi1>, vector<8x256xf32>
    %c136 = arith.constant 136 : index
    %c0_64 = arith.constant 0 : index
    %133 = vector.load %arg11[%c136, %c0_64] : memref<288x256xf32, #tpu.memory_space<vmem>>, vector<8x256xf32>
    tpu.vector_store %arg11[%c136, %c0_64], %132 {strides = array<i32>} : memref<288x256xf32, #tpu.memory_space<vmem>>, vector<8x256xf32>,
    %134 = vector.extract_strided_slice %12 {offsets = [0, 768], sizes = [8, 256], strides = [1, 1]} : vector<8x1024xf32> to vector<8x256xf32>
    %c34_i32 = arith.constant 34 : i32
    %135 = tpu.dynamic_rotate %134 by %c34_i32 dim 1 : vector<8x256xf32>, i32 -> vector<8x256xf32>
    %c2_i32 = arith.constant 2 : i32
    %136 = vector.broadcast %c2_i32 : i32 to vector<8x256xi32>
    %137 = arith.cmpi sge, %15, %136 : vector<8x256xi32>
    %c2_i32_65 = arith.constant 2 : i32
    %138 = vector.broadcast %c2_i32_65 : i32 to vector<8x256xi32>
    %139 = arith.cmpi sge, %17, %138 : vector<8x256xi32>
    %140 = arith.andi %137, %139 : vector<8x256xi1>
    %cst_66 = arith.constant 0.000000e+00 : f32
    %141 = vector.broadcast %cst_66 : f32 to vector<8x256xf32>
    %142 = arith.select %140, %135, %141 : vector<8x256xi1>, vector<8x256xf32>
    %c144 = arith.constant 144 : index
    %c0_67 = arith.constant 0 : index
    %143 = vector.load %arg11[%c144, %c0_67] : memref<288x256xf32, #tpu.memory_space<vmem>>, vector<8x256xf32>
    tpu.vector_store %arg11[%c144, %c0_67], %142 {strides = array<i32>} : memref<288x256xf32, #tpu.memory_space<vmem>>, vector<8x256xf32>,
    %144 = vector.extract_strided_slice %12 {offsets = [0, 512], sizes = [8, 256], strides = [1, 1]} : vector<8x1024xf32> to vector<8x256xf32>
    %c32_i32 = arith.constant 32 : i32
    %145 = tpu.dynamic_rotate %144 by %c32_i32 dim 1 : vector<8x256xf32>, i32 -> vector<8x256xf32>
    %c2_i32_68 = arith.constant 2 : i32
    %146 = vector.broadcast %c2_i32_68 : i32 to vector<8x256xi32>
    %147 = arith.cmpi sge, %15, %146 : vector<8x256xi32>
    %cst_69 = arith.constant 0.000000e+00 : f32
    %148 = vector.broadcast %cst_69 : f32 to vector<8x256xf32>
    %149 = arith.select %147, %145, %148 : vector<8x256xi1>, vector<8x256xf32>
    %c152 = arith.constant 152 : index
    %c0_70 = arith.constant 0 : index
    %150 = vector.load %arg11[%c152, %c0_70] : memref<288x256xf32, #tpu.memory_space<vmem>>, vector<8x256xf32>
    tpu.vector_store %arg11[%c152, %c0_70], %149 {strides = array<i32>} : memref<288x256xf32, #tpu.memory_space<vmem>>, vector<8x256xf32>,
    %151 = vector.extract_strided_slice %12 {offsets = [0, 768], sizes = [8, 256], strides = [1, 1]} : vector<8x1024xf32> to vector<8x256xf32>
    %c31_i32 = arith.constant 31 : i32
    %152 = tpu.dynamic_rotate %151 by %c31_i32 dim 1 : vector<8x256xf32>, i32 -> vector<8x256xf32>
    %c2_i32_71 = arith.constant 2 : i32
    %153 = vector.broadcast %c2_i32_71 : i32 to vector<8x256xi32>
    %154 = arith.cmpi sge, %15, %153 : vector<8x256xi32>
    %c15_i32_72 = arith.constant 15 : i32
    %155 = vector.broadcast %c15_i32_72 : i32 to vector<8x256xi32>
    %156 = arith.cmpi slt, %17, %155 : vector<8x256xi32>
    %157 = arith.andi %154, %156 : vector<8x256xi1>
    %cst_73 = arith.constant 0.000000e+00 : f32
    %158 = vector.broadcast %cst_73 : f32 to vector<8x256xf32>
    %159 = arith.select %157, %152, %158 : vector<8x256xi1>, vector<8x256xf32>
    %c160 = arith.constant 160 : index
    %c0_74 = arith.constant 0 : index
    %160 = vector.load %arg11[%c160, %c0_74] : memref<288x256xf32, #tpu.memory_space<vmem>>, vector<8x256xf32>
    tpu.vector_store %arg11[%c160, %c0_74], %159 {strides = array<i32>} : memref<288x256xf32, #tpu.memory_space<vmem>>, vector<8x256xf32>,
    %161 = vector.extract_strided_slice %12 {offsets = [0, 256], sizes = [8, 256], strides = [1, 1]} : vector<8x1024xf32> to vector<8x256xf32>
    %c2_i32_75 = arith.constant 2 : i32
    %162 = tpu.dynamic_rotate %161 by %c2_i32_75 dim 1 : vector<8x256xf32>, i32 -> vector<8x256xf32>
    %c2_i32_76 = arith.constant 2 : i32
    %163 = vector.broadcast %c2_i32_76 : i32 to vector<8x256xi32>
    %164 = arith.cmpi sge, %17, %163 : vector<8x256xi32>
    %cst_77 = arith.constant 0.000000e+00 : f32
    %165 = vector.broadcast %cst_77 : f32 to vector<8x256xf32>
    %166 = arith.select %164, %162, %165 : vector<8x256xi1>, vector<8x256xf32>
    %c168 = arith.constant 168 : index
    %c0_78 = arith.constant 0 : index
    %167 = vector.load %arg11[%c168, %c0_78] : memref<288x256xf32, #tpu.memory_space<vmem>>, vector<8x256xf32>
    tpu.vector_store %arg11[%c168, %c0_78], %166 {strides = array<i32>} : memref<288x256xf32, #tpu.memory_space<vmem>>, vector<8x256xf32>,
    %168 = vector.extract_strided_slice %12 {offsets = [0, 0], sizes = [8, 256], strides = [1, 1]} : vector<8x1024xf32> to vector<8x256xf32>
    %c176 = arith.constant 176 : index
    %c0_79 = arith.constant 0 : index
    %169 = vector.load %arg11[%c176, %c0_79] : memref<288x256xf32, #tpu.memory_space<vmem>>, vector<8x256xf32>
    tpu.vector_store %arg11[%c176, %c0_79], %168 {strides = array<i32>} : memref<288x256xf32, #tpu.memory_space<vmem>>, vector<8x256xf32>,
    %170 = vector.extract_strided_slice %12 {offsets = [0, 256], sizes = [8, 256], strides = [1, 1]} : vector<8x1024xf32> to vector<8x256xf32>
    %c255_i32_80 = arith.constant 255 : i32
    %171 = tpu.dynamic_rotate %170 by %c255_i32_80 dim 1 : vector<8x256xf32>, i32 -> vector<8x256xf32>
    %c15_i32_81 = arith.constant 15 : i32
    %172 = vector.broadcast %c15_i32_81 : i32 to vector<8x256xi32>
    %173 = arith.cmpi slt, %17, %172 : vector<8x256xi32>
    %cst_82 = arith.constant 0.000000e+00 : f32
    %174 = vector.broadcast %cst_82 : f32 to vector<8x256xf32>
    %175 = arith.select %173, %171, %174 : vector<8x256xi1>, vector<8x256xf32>
    %c184 = arith.constant 184 : index
    %c0_83 = arith.constant 0 : index
    %176 = vector.load %arg11[%c184, %c0_83] : memref<288x256xf32, #tpu.memory_space<vmem>>, vector<8x256xf32>
    tpu.vector_store %arg11[%c184, %c0_83], %175 {strides = array<i32>} : memref<288x256xf32, #tpu.memory_space<vmem>>, vector<8x256xf32>,
    %177 = vector.extract_strided_slice %12 {offsets = [0, 768], sizes = [8, 256], strides = [1, 1]} : vector<8x1024xf32> to vector<8x256xf32>
    %c242_i32 = arith.constant 242 : i32
    %178 = tpu.dynamic_rotate %177 by %c242_i32 dim 1 : vector<8x256xf32>, i32 -> vector<8x256xf32>
    %c15_i32_84 = arith.constant 15 : i32
    %179 = vector.broadcast %c15_i32_84 : i32 to vector<8x256xi32>
    %180 = arith.cmpi slt, %15, %179 : vector<8x256xi32>
    %c2_i32_85 = arith.constant 2 : i32
    %181 = vector.broadcast %c2_i32_85 : i32 to vector<8x256xi32>
    %182 = arith.cmpi sge, %17, %181 : vector<8x256xi32>
    %183 = arith.andi %180, %182 : vector<8x256xi1>
    %cst_86 = arith.constant 0.000000e+00 : f32
    %184 = vector.broadcast %cst_86 : f32 to vector<8x256xf32>
    %185 = arith.select %183, %178, %184 : vector<8x256xi1>, vector<8x256xf32>
    %c192 = arith.constant 192 : index
    %c0_87 = arith.constant 0 : index
    %186 = vector.load %arg11[%c192, %c0_87] : memref<288x256xf32, #tpu.memory_space<vmem>>, vector<8x256xf32>
    tpu.vector_store %arg11[%c192, %c0_87], %185 {strides = array<i32>} : memref<288x256xf32, #tpu.memory_space<vmem>>, vector<8x256xf32>,
    %187 = vector.extract_strided_slice %12 {offsets = [0, 512], sizes = [8, 256], strides = [1, 1]} : vector<8x1024xf32> to vector<8x256xf32>
    %c240_i32_88 = arith.constant 240 : i32
    %188 = tpu.dynamic_rotate %187 by %c240_i32_88 dim 1 : vector<8x256xf32>, i32 -> vector<8x256xf32>
    %c15_i32_89 = arith.constant 15 : i32
    %189 = vector.broadcast %c15_i32_89 : i32 to vector<8x256xi32>
    %190 = arith.cmpi slt, %15, %189 : vector<8x256xi32>
    %cst_90 = arith.constant 0.000000e+00 : f32
    %191 = vector.broadcast %cst_90 : f32 to vector<8x256xf32>
    %192 = arith.select %190, %188, %191 : vector<8x256xi1>, vector<8x256xf32>
    %c200 = arith.constant 200 : index
    %c0_91 = arith.constant 0 : index
    %193 = vector.load %arg11[%c200, %c0_91] : memref<288x256xf32, #tpu.memory_space<vmem>>, vector<8x256xf32>
    tpu.vector_store %arg11[%c200, %c0_91], %192 {strides = array<i32>} : memref<288x256xf32, #tpu.memory_space<vmem>>, vector<8x256xf32>,
    %194 = vector.extract_strided_slice %12 {offsets = [0, 768], sizes = [8, 256], strides = [1, 1]} : vector<8x1024xf32> to vector<8x256xf32>
    %c239_i32_92 = arith.constant 239 : i32
    %195 = tpu.dynamic_rotate %194 by %c239_i32_92 dim 1 : vector<8x256xf32>, i32 -> vector<8x256xf32>
    %c15_i32_93 = arith.constant 15 : i32
    %196 = vector.broadcast %c15_i32_93 : i32 to vector<8x256xi32>
    %197 = arith.cmpi slt, %15, %196 : vector<8x256xi32>
    %c15_i32_94 = arith.constant 15 : i32
    %198 = vector.broadcast %c15_i32_94 : i32 to vector<8x256xi32>
    %199 = arith.cmpi slt, %17, %198 : vector<8x256xi32>
    %200 = arith.andi %197, %199 : vector<8x256xi1>
    %cst_95 = arith.constant 0.000000e+00 : f32
    %201 = vector.broadcast %cst_95 : f32 to vector<8x256xf32>
    %202 = arith.select %200, %195, %201 : vector<8x256xi1>, vector<8x256xf32>
    %c208 = arith.constant 208 : index
    %c0_96 = arith.constant 0 : index
    %203 = vector.load %arg11[%c208, %c0_96] : memref<288x256xf32, #tpu.memory_space<vmem>>, vector<8x256xf32>
    tpu.vector_store %arg11[%c208, %c0_96], %202 {strides = array<i32>} : memref<288x256xf32, #tpu.memory_space<vmem>>, vector<8x256xf32>,
    %204 = vector.extract_strided_slice %12 {offsets = [0, 0], sizes = [8, 256], strides = [1, 1]} : vector<8x1024xf32> to vector<8x256xf32>
    %c34_i32_97 = arith.constant 34 : i32
    %205 = tpu.dynamic_rotate %204 by %c34_i32_97 dim 1 : vector<8x256xf32>, i32 -> vector<8x256xf32>
    %c2_i32_98 = arith.constant 2 : i32
    %206 = vector.broadcast %c2_i32_98 : i32 to vector<8x256xi32>
    %207 = arith.cmpi sge, %15, %206 : vector<8x256xi32>
    %c2_i32_99 = arith.constant 2 : i32
    %208 = vector.broadcast %c2_i32_99 : i32 to vector<8x256xi32>
    %209 = arith.cmpi sge, %17, %208 : vector<8x256xi32>
    %210 = arith.andi %207, %209 : vector<8x256xi1>
    %cst_100 = arith.constant 0.000000e+00 : f32
    %211 = vector.broadcast %cst_100 : f32 to vector<8x256xf32>
    %212 = arith.select %210, %205, %211 : vector<8x256xi1>, vector<8x256xf32>
    %c216 = arith.constant 216 : index
    %c0_101 = arith.constant 0 : index
    %213 = vector.load %arg11[%c216, %c0_101] : memref<288x256xf32, #tpu.memory_space<vmem>>, vector<8x256xf32>
    tpu.vector_store %arg11[%c216, %c0_101], %212 {strides = array<i32>} : memref<288x256xf32, #tpu.memory_space<vmem>>, vector<8x256xf32>,
    %214 = vector.extract_strided_slice %12 {offsets = [0, 0], sizes = [8, 256], strides = [1, 1]} : vector<8x1024xf32> to vector<8x256xf32>
    %c32_i32_102 = arith.constant 32 : i32
    %215 = tpu.dynamic_rotate %214 by %c32_i32_102 dim 1 : vector<8x256xf32>, i32 -> vector<8x256xf32>
    %c2_i32_103 = arith.constant 2 : i32
    %216 = vector.broadcast %c2_i32_103 : i32 to vector<8x256xi32>
    %217 = arith.cmpi sge, %15, %216 : vector<8x256xi32>
    %cst_104 = arith.constant 0.000000e+00 : f32
    %218 = vector.broadcast %cst_104 : f32 to vector<8x256xf32>
    %219 = arith.select %217, %215, %218 : vector<8x256xi1>, vector<8x256xf32>
    %c224 = arith.constant 224 : index
    %c0_105 = arith.constant 0 : index
    %220 = vector.load %arg11[%c224, %c0_105] : memref<288x256xf32, #tpu.memory_space<vmem>>, vector<8x256xf32>
    tpu.vector_store %arg11[%c224, %c0_105], %219 {strides = array<i32>} : memref<288x256xf32, #tpu.memory_space<vmem>>, vector<8x256xf32>,
    %221 = vector.extract_strided_slice %12 {offsets = [0, 0], sizes = [8, 256], strides = [1, 1]} : vector<8x1024xf32> to vector<8x256xf32>
    %c30_i32 = arith.constant 30 : i32
    %222 = tpu.dynamic_rotate %221 by %c30_i32 dim 1 : vector<8x256xf32>, i32 -> vector<8x256xf32>
    %c2_i32_106 = arith.constant 2 : i32
    %223 = vector.broadcast %c2_i32_106 : i32 to vector<8x256xi32>
    %224 = arith.cmpi sge, %15, %223 : vector<8x256xi32>
    %c14_i32 = arith.constant 14 : i32
    %225 = vector.broadcast %c14_i32 : i32 to vector<8x256xi32>
    %226 = arith.cmpi slt, %17, %225 : vector<8x256xi32>
    %227 = arith.andi %224, %226 : vector<8x256xi1>
    %cst_107 = arith.constant 0.000000e+00 : f32
    %228 = vector.broadcast %cst_107 : f32 to vector<8x256xf32>
    %229 = arith.select %227, %222, %228 : vector<8x256xi1>, vector<8x256xf32>
    %c232 = arith.constant 232 : index
    %c0_108 = arith.constant 0 : index
    %230 = vector.load %arg11[%c232, %c0_108] : memref<288x256xf32, #tpu.memory_space<vmem>>, vector<8x256xf32>
    tpu.vector_store %arg11[%c232, %c0_108], %229 {strides = array<i32>} : memref<288x256xf32, #tpu.memory_space<vmem>>, vector<8x256xf32>,
    %231 = vector.extract_strided_slice %12 {offsets = [0, 0], sizes = [8, 256], strides = [1, 1]} : vector<8x1024xf32> to vector<8x256xf32>
    %c2_i32_109 = arith.constant 2 : i32
    %232 = tpu.dynamic_rotate %231 by %c2_i32_109 dim 1 : vector<8x256xf32>, i32 -> vector<8x256xf32>
    %c2_i32_110 = arith.constant 2 : i32
    %233 = vector.broadcast %c2_i32_110 : i32 to vector<8x256xi32>
    %234 = arith.cmpi sge, %17, %233 : vector<8x256xi32>
    %cst_111 = arith.constant 0.000000e+00 : f32
    %235 = vector.broadcast %cst_111 : f32 to vector<8x256xf32>
    %236 = arith.select %234, %232, %235 : vector<8x256xi1>, vector<8x256xf32>
    %c240 = arith.constant 240 : index
    %c0_112 = arith.constant 0 : index
    %237 = vector.load %arg11[%c240, %c0_112] : memref<288x256xf32, #tpu.memory_space<vmem>>, vector<8x256xf32>
    tpu.vector_store %arg11[%c240, %c0_112], %236 {strides = array<i32>} : memref<288x256xf32, #tpu.memory_space<vmem>>, vector<8x256xf32>,
    %238 = vector.extract_strided_slice %12 {offsets = [0, 0], sizes = [8, 256], strides = [1, 1]} : vector<8x1024xf32> to vector<8x256xf32>
    %c248 = arith.constant 248 : index
    %c0_113 = arith.constant 0 : index
    %239 = vector.load %arg11[%c248, %c0_113] : memref<288x256xf32, #tpu.memory_space<vmem>>, vector<8x256xf32>
    tpu.vector_store %arg11[%c248, %c0_113], %238 {strides = array<i32>} : memref<288x256xf32, #tpu.memory_space<vmem>>, vector<8x256xf32>,
    %240 = vector.extract_strided_slice %12 {offsets = [0, 0], sizes = [8, 256], strides = [1, 1]} : vector<8x1024xf32> to vector<8x256xf32>
    %c254_i32 = arith.constant 254 : i32
    %241 = tpu.dynamic_rotate %240 by %c254_i32 dim 1 : vector<8x256xf32>, i32 -> vector<8x256xf32>
    %c14_i32_114 = arith.constant 14 : i32
    %242 = vector.broadcast %c14_i32_114 : i32 to vector<8x256xi32>
    %243 = arith.cmpi slt, %17, %242 : vector<8x256xi32>
    %cst_115 = arith.constant 0.000000e+00 : f32
    %244 = vector.broadcast %cst_115 : f32 to vector<8x256xf32>
    %245 = arith.select %243, %241, %244 : vector<8x256xi1>, vector<8x256xf32>
    %c256 = arith.constant 256 : index
    %c0_116 = arith.constant 0 : index
    %246 = vector.load %arg11[%c256, %c0_116] : memref<288x256xf32, #tpu.memory_space<vmem>>, vector<8x256xf32>
    tpu.vector_store %arg11[%c256, %c0_116], %245 {strides = array<i32>} : memref<288x256xf32, #tpu.memory_space<vmem>>, vector<8x256xf32>,
    %247 = vector.extract_strided_slice %12 {offsets = [0, 0], sizes = [8, 256], strides = [1, 1]} : vector<8x1024xf32> to vector<8x256xf32>
    %c226_i32 = arith.constant 226 : i32
    %248 = tpu.dynamic_rotate %247 by %c226_i32 dim 1 : vector<8x256xf32>, i32 -> vector<8x256xf32>
    %c14_i32_117 = arith.constant 14 : i32
    %249 = vector.broadcast %c14_i32_117 : i32 to vector<8x256xi32>
    %250 = arith.cmpi slt, %15, %249 : vector<8x256xi32>
    %c2_i32_118 = arith.constant 2 : i32
    %251 = vector.broadcast %c2_i32_118 : i32 to vector<8x256xi32>
    %252 = arith.cmpi sge, %17, %251 : vector<8x256xi32>
    %253 = arith.andi %250, %252 : vector<8x256xi1>
    %cst_119 = arith.constant 0.000000e+00 : f32
    %254 = vector.broadcast %cst_119 : f32 to vector<8x256xf32>
    %255 = arith.select %253, %248, %254 : vector<8x256xi1>, vector<8x256xf32>
    %c264 = arith.constant 264 : index
    %c0_120 = arith.constant 0 : index
    %256 = vector.load %arg11[%c264, %c0_120] : memref<288x256xf32, #tpu.memory_space<vmem>>, vector<8x256xf32>
    tpu.vector_store %arg11[%c264, %c0_120], %255 {strides = array<i32>} : memref<288x256xf32, #tpu.memory_space<vmem>>, vector<8x256xf32>,
    %257 = vector.extract_strided_slice %12 {offsets = [0, 0], sizes = [8, 256], strides = [1, 1]} : vector<8x1024xf32> to vector<8x256xf32>
    %c224_i32 = arith.constant 224 : i32
    %258 = tpu.dynamic_rotate %257 by %c224_i32 dim 1 : vector<8x256xf32>, i32 -> vector<8x256xf32>
    %c14_i32_121 = arith.constant 14 : i32
    %259 = vector.broadcast %c14_i32_121 : i32 to vector<8x256xi32>
    %260 = arith.cmpi slt, %15, %259 : vector<8x256xi32>
    %cst_122 = arith.constant 0.000000e+00 : f32
    %261 = vector.broadcast %cst_122 : f32 to vector<8x256xf32>
    %262 = arith.select %260, %258, %261 : vector<8x256xi1>, vector<8x256xf32>
    %c272 = arith.constant 272 : index
    %c0_123 = arith.constant 0 : index
    %263 = vector.load %arg11[%c272, %c0_123] : memref<288x256xf32, #tpu.memory_space<vmem>>, vector<8x256xf32>
    tpu.vector_store %arg11[%c272, %c0_123], %262 {strides = array<i32>} : memref<288x256xf32, #tpu.memory_space<vmem>>, vector<8x256xf32>,
    %264 = vector.extract_strided_slice %12 {offsets = [0, 0], sizes = [8, 256], strides = [1, 1]} : vector<8x1024xf32> to vector<8x256xf32>
    %c222_i32 = arith.constant 222 : i32
    %265 = tpu.dynamic_rotate %264 by %c222_i32 dim 1 : vector<8x256xf32>, i32 -> vector<8x256xf32>
    %c14_i32_124 = arith.constant 14 : i32
    %266 = vector.broadcast %c14_i32_124 : i32 to vector<8x256xi32>
    %267 = arith.cmpi slt, %15, %266 : vector<8x256xi32>
    %c14_i32_125 = arith.constant 14 : i32
    %268 = vector.broadcast %c14_i32_125 : i32 to vector<8x256xi32>
    %269 = arith.cmpi slt, %17, %268 : vector<8x256xi32>
    %270 = arith.andi %267, %269 : vector<8x256xi1>
    %cst_126 = arith.constant 0.000000e+00 : f32
    %271 = vector.broadcast %cst_126 : f32 to vector<8x256xf32>
    %272 = arith.select %270, %265, %271 : vector<8x256xi1>, vector<8x256xf32>
    %c280 = arith.constant 280 : index
    %c0_127 = arith.constant 0 : index
    %273 = vector.load %arg11[%c280, %c0_127] : memref<288x256xf32, #tpu.memory_space<vmem>>, vector<8x256xf32>
    tpu.vector_store %arg11[%c280, %c0_127], %272 {strides = array<i32>} : memref<288x256xf32, #tpu.memory_space<vmem>>, vector<8x256xf32>,
    %c0_128 = arith.constant 0 : index
    %c0_129 = arith.constant 0 : index
    %274 = vector.load %arg3[%c0_128, %c0_129] : memref<32x288xf32, #tpu.memory_space<vmem>>, vector<32x288xf32>
    %c0_130 = arith.constant 0 : index
    %c0_131 = arith.constant 0 : index
    %275 = vector.load %arg11[%c0_130, %c0_131] : memref<288x256xf32, #tpu.memory_space<vmem>>, vector<288x256xf32>
    %cst_132 = arith.constant dense<0.000000e+00> : vector<32x256xf32>
    %276 = tpu.matmul %274, %275, %cst_132 {dimension_numbers = #tpu.dot_dimension_numbers<[1], [0], [0], [1], [0, 0, 1, 1], [], []>} : vector<32x288xf32>, vector<288x256xf32>, vector<32x256xf32> -> vector<32x256xf32>
    %c0_133 = arith.constant 0 : index
    %c0_134 = arith.constant 0 : index
    %277 = vector.load %arg7[%c0_133, %c0_134] : memref<32x1xf32, #tpu.memory_space<vmem>>, vector<32x1xf32>
    %278 = vector.broadcast %277 : vector<32x1xf32> to vector<32x256xf32>
    %279 = arith.addf %276, %278 : vector<32x256xf32>
    %cst_135 = arith.constant 0.000000e+00 : f32
    %280 = vector.broadcast %cst_135 : f32 to vector<32x256xf32>
    %281 = arith.cmpf oge, %279, %280 : vector<32x256xf32>
    %c0_136 = arith.constant 0 : index
    %c0_137 = arith.constant 0 : index
    %282 = vector.load %arg8[%c0_136, %c0_137] : memref<32x1xf32, #tpu.memory_space<vmem>>, vector<32x1xf32>
    %283 = vector.broadcast %282 : vector<32x1xf32> to vector<32x256xf32>
    %284 = arith.mulf %283, %279 : vector<32x256xf32>
    %285 = arith.select %281, %279, %284 : vector<32x256xi1>, vector<32x256xf32>
    %c0_138 = arith.constant 0 : index
    %c0_139 = arith.constant 0 : index
    %286 = vector.load %arg4[%c0_138, %c0_139] : memref<32x32xf32, #tpu.memory_space<vmem>>, vector<32x32xf32>
    %cst_140 = arith.constant dense<0.000000e+00> : vector<32x256xf32>
    %287 = tpu.matmul %286, %285, %cst_140 {dimension_numbers = #tpu.dot_dimension_numbers<[1], [0], [0], [1], [0, 0, 1, 1], [], []>} : vector<32x32xf32>, vector<32x256xf32>, vector<32x256xf32> -> vector<32x256xf32>
    %c0_141 = arith.constant 0 : index
    %c0_142 = arith.constant 0 : index
    %288 = vector.load %arg9[%c0_141, %c0_142] : memref<32x1xf32, #tpu.memory_space<vmem>>, vector<32x1xf32>
    %289 = vector.broadcast %288 : vector<32x1xf32> to vector<32x256xf32>
    %290 = arith.addf %287, %289 : vector<32x256xf32>
    %c0_143 = arith.constant 0 : index
    %c0_144 = arith.constant 0 : index
    %c0_145 = arith.constant 0 : index
    %291 = vector.load %arg10[%c0_143, %c0_144, %c0_145] : memref<1x32x256xf32, #tpu.memory_space<vmem>>, vector<1x32x256xf32>
    %292 = vector.shape_cast %291 : vector<1x32x256xf32> to vector<32x256xf32>
    %293 = vector.shape_cast %290 : vector<32x256xf32> to vector<1x32x256xf32>
    tpu.vector_store %arg10[%c0_143, %c0_144, %c0_145], %293 {strides = array<i32>} : memref<1x32x256xf32, #tpu.memory_space<vmem>>, vector<1x32x256xf32>,
    return
  }
  func.func @transform_0(%arg0: i32) -> (i32, i32, i32) {
    %c0_i32 = arith.constant 0 : i32
    %c0_i32_0 = arith.constant 0 : i32
    %c0_i32_1 = arith.constant 0 : i32
    return %arg0, %c0_i32, %c0_i32_0 : i32, i32, i32
  }
  func.func @transform_1(%arg0: i32) -> (i32, i32) {
    %c0_i32 = arith.constant 0 : i32
    %c0_i32_0 = arith.constant 0 : i32
    %c0_i32_1 = arith.constant 0 : i32
    return %c0_i32, %c0_i32_0 : i32, i32
  }
  func.func @transform_2(%arg0: i32) -> (i32, i32) {
    %c0_i32 = arith.constant 0 : i32
    %c0_i32_0 = arith.constant 0 : i32
    %c0_i32_1 = arith.constant 0 : i32
    return %c0_i32, %c0_i32_0 : i32, i32
  }
  func.func @transform_3(%arg0: i32) -> (i32, i32) {
    %c0_i32 = arith.constant 0 : i32
    %c0_i32_0 = arith.constant 0 : i32
    %c0_i32_1 = arith.constant 0 : i32
    return %c0_i32, %c0_i32_0 : i32, i32
  }
  func.func @transform_4(%arg0: i32) -> (i32, i32) {
    %c0_i32 = arith.constant 0 : i32
    %c0_i32_0 = arith.constant 0 : i32
    %c0_i32_1 = arith.constant 0 : i32
    return %c0_i32, %c0_i32_0 : i32, i32
  }
  func.func @transform_5(%arg0: i32) -> (i32, i32) {
    %c0_i32 = arith.constant 0 : i32
    %c0_i32_0 = arith.constant 0 : i32
    %c0_i32_1 = arith.constant 0 : i32
    return %c0_i32, %c0_i32_0 : i32, i32
  }
  func.func @transform_6(%arg0: i32) -> (i32, i32) {
    %c0_i32 = arith.constant 0 : i32
    %c0_i32_0 = arith.constant 0 : i32
    %c0_i32_1 = arith.constant 0 : i32
    return %c0_i32, %c0_i32_0 : i32, i32
  }
  func.func @transform_7(%arg0: i32) -> (i32, i32) {
    %c0_i32 = arith.constant 0 : i32
    %c0_i32_0 = arith.constant 0 : i32
    %c0_i32_1 = arith.constant 0 : i32
    return %c0_i32, %c0_i32_0 : i32, i32
  }
  func.func @transform_8(%arg0: i32) -> (i32, i32) {
    %c0_i32 = arith.constant 0 : i32
    %c0_i32_0 = arith.constant 0 : i32
    %c0_i32_1 = arith.constant 0 : i32
    return %c0_i32, %c0_i32_0 : i32, i32
  }
  func.func @transform_9(%arg0: i32) -> (i32, i32, i32) {
    %c0_i32 = arith.constant 0 : i32
    %c0_i32_0 = arith.constant 0 : i32
    %c0_i32_1 = arith.constant 0 : i32
    return %arg0, %c0_i32, %c0_i32_0 : i32, i32, i32
  }
}

</mosaic_0001>

<bundles_post_ra>
// kernel: tpu_custom_call.1
= control target key start
LH: loop header
LB: loop body
LE: loop exit
PB: predicated region body
PF: predicated region fallthrough
CT: control target
= control target key end

     0   :  { %s2872_s0 = inlined_call_operand.hbm [shape: f32[2,16,1024], index: 0, kind: input, shape index: {}]   ;;  %s2873_s1 = inlined_call_operand.vmem [shape: f32[8,16], index: 1, kind: input, shape index: {}]   ;;  %s2874_s2 = inlined_call_operand.vmem [shape: f32[32,288], index: 2, kind: input, shape index: {}]   ;;  %s2875_s3 = inlined_call_operand.hbm [shape: f32[32,32], index: 3, kind: input, shape index: {}]   ;;  %s2876_s4 = inlined_call_operand.vmem [shape: f32[8,1], index: 4, kind: input, shape index: {}]   ;;  %s2877_s5 = inlined_call_operand.vmem [shape: f32[8,1], index: 5, kind: input, shape index: {}]   ;;  %s2878_s6 = inlined_call_operand.vmem [shape: f32[32,1], index: 6, kind: input, shape index: {}]   ;;  %s2879_s7 = inlined_call_operand.vmem [shape: f32[32,1], index: 7, kind: input, shape index: {}]   ;;  %s2880_s8 = inlined_call_operand.vmem [shape: f32[32,1], index: 8, kind: input, shape index: {}]   ;;  %s2881_s9 = inlined_call_operand.hbm [shape: f32[2,32,256], index: 9, kind: output, shape index: {}]  }
   0x1   :  { %2903 = sst [smem:[#allocation14_spill]] %s2875_s3 }
   0x2   :  { %14 = vsyncpa [#allocation4], 0 }
   0x3   :  { %16 = vsyncpa [#allocation4 + $0x1], 0 }
   0x4   :  { %17 = vsyncpa [#allocation7], 0 }
   0x5   :  { %18 = vsyncpa [#allocation5], 0 }
   0x6   :  { %20 = vsyncpa [#allocation5 + $0x1], 0  ;;  %s2027_s30 = smov 0   ;;  %s2029_s10 = smov 0  }
   0x7   :  { %s2031_s11 = smov 0   ;;  %s2033_s12 = smov 0  }
   0x8 LB: > { %s2048_s13 = sadd.s32 4294967295, %s1947_s12   ;;  %s1653_s14 = sadd.s32 4294967294, %s1947_s12   ;;  %s1947_s12 = sphi %s2033_s12, %s2965_s12   ;;  %s1943_s11 = sphi %s2031_s11, %s2968_s11   ;;  %s1939_s10 = sphi %s2029_s10, %s2967_s10   ;;  %s1935_s30 = sphi %s2027_s30, %s2966_s30  }
   0x9   : > { %p46_p0 = scmp.ne.s32.totalorder %s1939_s10, %s1935_s30  ;;  %p2885_p1 = scmp.eq.s32.totalorder %s2048_s13, 0 }
   0xa   : > { %p244_p3 = scmp.eq.s32.totalorder %s1653_s14, 1  ;;  %p1654_p5 = scmp.ge.s32.totalorder %s1947_s12, 1 }
   0xb   : > { %p2057_p4 = por %p2885_p1, %p46_p0  ;;  %p251_p7 = scmp.lt.s32.totalorder %s1947_s12, 3 }
   0xc   : > { %p2062_p6 = por %p244_p3, %p46_p0  ;;  %s1949_s18 = smov [#allocation6]  }
   0xd   : > { %s2904_s15 = scalar_select %p2057_p4, 1, 0 }
   0xe   : > { %s2905_s16 = scalar_select %p2062_p6, 1, 0 }
   0xf   : > { %p2067_p8 = pnand %p1654_p5, %p251_p7  ;;  %s269_s19 = sshll.u32 %s1949_s18, 4  ;;  %s270_s19 = int_to_ptr.vmem [resolvable:$true] %s269_s19 }
  0x10   : > { %2906 = sst [smem:[#allocation12_spill]] %s2905_s16  ;;  %s2081_s21 = sadd.s32 1, %s1947_s12  }
  0x11   : > { %s2907_s17 = scalar_select %p2067_p8, 1, 0 }
  0x12   : > { %p1749_p9 = pneg %p2067_p8  ;;  %2909 = sst [smem:[#allocation13_spill]] %s2081_s21 }
  0x13   : > { %s33_s22 = sadd.s32 1, %s1943_s11  ;;  %s30_s23 = ssub.s32 %s1947_s12, %s2081_s21 }
  0x14   : > { %p2076_p11 = pnand %p1749_p9, %p2885_p1  ;;  %s1836_s24 = scalar_lea.vmem %s270_s19, 512 }
  0x15   : > { %p1837_p13 = scmp.ne.s32.totalorder %s270_s19, %s1836_s24  ;;  %p1844_p5 = scmp.lt.s32.totalorder %s270_s19, %s270_s19 }
  0x16   : > { %p1827_p12 = pneg %p2076_p11  ;;  %p1845_p7 = scmp.lt.s32.totalorder %s1836_s24, %s1836_s24 }
  0x18   : > { %p1839_p0 = pnand %p1837_p13, %p1827_p12  ;;  %p1846_p10 = por %p1845_p7, %p1844_p5 }
  0x1a   : > { %p1840_p3 = pneg %p1839_p0 }
  0x1c   : > { %p1847_p2 = pnand %p1846_p10, %p1840_p3 }
  0x1e   : > { %1850 = shalt.err (!%p1847_p2)
}
  0x1f   : > { %s1950_s25 = smov 128   ;;  %s1951_s26 = smov 8  }
  0x20   : > { %s2910_s3 = sld [smem:[#allocation14_spill]]  ;;  %p31_p9 = scmp.eq.s32.totalorder %s30_s23, 0 }
  0x21   : > { %p40_p12 = scmp.ne.s32.totalorder %s1943_s11, %s1939_s10  ;;  %p41_p10 = scmp.eq.s32.totalorder %s1947_s12, 0 }
  0x22   : > { %p1762_p2 = scmp.lt.s32.totalorder %s1947_s12, 2  ;;  %p2911_p0 = scmp.eq.s32.totalorder %s2048_s13, 1 }
  0x23   : > { %s2098_s29 = scalar_select %p31_p9, %s1943_s11, %s33_s22  }
  0x24   : > { %p42_p13 = por %p41_p10, %p40_p12  ;;  %p2102_p3 = por %p2911_p0, %p40_p12 }
  0x25   : > { %s298_s18 = sand.u32 1, %s1943_s11   ;;  %s1681_s24 = sshll.u32 %s1947_s12, 11 }
  0x26   : > { %1752 = dma.hbm_to_vmem [thread:$0]  (!%p2076_p11), %s2910_s3, 512, %s270_s19, [#allocation7], %s1950_s25, %s1950_s25, %s1951_s26  }
  0x27   : > { %s2912_s14 = scalar_select %p2102_p3, 1, 0 }
  0x28   : > { %s1657_s21 = sshll.u32 %s298_s18, 7  ;;  %s2111_s27 = scalar_lea.hbm %s2872_s0, %s1681_s24 }
  0x29   : > { %s302_s19 = scalar_lea.vmem [#allocation3], %s1657_s21  ;;  %p2113_p11 = pnand %p1762_p2, %p42_p13 }
  0x2a   : > { %s309_s22 = sshll.u32 %s302_s19, 4  ;;  %s2119_s25 = scalar_lea.sflag [#allocation4], %s298_s18  ;;  %s2117_s22 = int_to_ptr.vmem [resolvable:$true] %s309_s22 }
  0x2b   : > { %s1851_s26 = scalar_lea.hbm %s2111_s27, 2048  ;;  %p1853_p7 = pneg %p2113_p11 }
  0x2c   : > { %p1852_p5 = scmp.ne.s32.totalorder %s2111_s27, %s1851_s26  ;;  %s1856_s21 = scalar_lea.hbm %s2872_s0, 4096 }
  0x2d   : > { %p1857_p10 = scmp.lt.s32.totalorder %s2111_s27, %s2872_s0  ;;  %p1858_p2 = scmp.lt.s32.totalorder %s1856_s21, %s1851_s26 }
  0x2e   : > { %p1854_p9 = pnand %p1853_p7, %p1852_p5 }
  0x2f   : > { %p1859_p13 = por %p1858_p2, %p1857_p10 }
  0x30   : > { %p1855_p12 = pneg %p1854_p9 }
  0x32   : > { %p1860_p0 = pnand %p1859_p13, %p1855_p12 }
  0x34   : > { %1863 = shalt.err (!%p1860_p0)
}
  0x35   : > { %s1864_s18 = scalar_lea.vmem %s2117_s22, 2048  ;;  %s1952_s19 = smov [#allocation3]  }
  0x36   : > { %p1865_p1 = scmp.ne.s32.totalorder %s2117_s22, %s1864_s18  ;;  %s1869_s3 = sshll.u32 %s1952_s19, 4  ;;  %s1870_s3 = int_to_ptr.vmem [resolvable:$false] %s1869_s3 }
  0x37   : > { %s1871_s16 = scalar_lea.vmem %s1870_s3, 4096  ;;  %p1872_p9 = scmp.lt.s32.totalorder %s2117_s22, %s1870_s3 }
  0x38   : > { %p1867_p6 = pnand %p1865_p1, %p1853_p7  ;;  %p1873_p3 = scmp.lt.s32.totalorder %s1871_s16, %s1864_s18 }
  0x3a   : > { %p1868_p5 = pneg %p1867_p6  ;;  %p1874_p4 = por %p1873_p3, %p1872_p9 }
  0x3c   : > { %p1875_p8 = pnand %p1874_p4, %p1868_p5 }
  0x3e   : > { %1878 = shalt.err (!%p1875_p8)
}
  0x3f   : > { %s1953_s26 = smov 1024   ;;  %s1954_s28 = smov 64  }
  0x40   : > { %1756 = dma.hbm_to_vmem [thread:$0]  (!%p2113_p11), %s2111_s27, 2048, %s2117_s22, %s2119_s25, %s1953_s26, %s1953_s26, %s1954_s28  }
  0x41   : > { %p2914_p1 = scmp.ne.s32.totalorder %s2907_s17, 0 }
  0x42   : > { %s2143_s21 = sand.u32 (!%p2914_p1), 1, %s1939_s10   ;;  %p2915_p4 = scmp.ne.s32.totalorder (!%p2914_p1), %s2904_s15, 0 }
  0x43   : > { %321 = sbr.rel (%p2914_p1) target bundleno = 957 (0x3bd), region = 56  ;;  %s1661_s3 = sshll.u32 (!%p2914_p1), %s2143_s21, 7 }
  0x44   : > { %s324_s24 = scalar_lea.sflag (!%p2914_p1), [#allocation4], %s2143_s21  ;;  %s2147_s20 = scalar_lea.vmem (!%p2914_p1), [#allocation3], %s1661_s3 }
  0x48   : > { %1922 = dma.done.wait (%p2915_p4), %s324_s24, 2048  }
  0x49   : > { %1924 = vsyncadd (%p2915_p4), %s324_s24, 4294965248  ;;  %p2916_p6 = scmp.eq.s32.totalorder %s2048_s13, 0 }
  0x4b   : > { %1926 = dma.done.wait (%p2916_p6), [#allocation7], 512   ;;  %p2917_p8 = pmov %p2916_p6 }
  0x4c   : > { %v1955_v0 = vmov 0.0   ;;  %v1956_v1 = vmov 0   ;;  %v376_v2 = vld [vmem:[%s2147_s20 + $0x48] sm:$0xff]  ;;  %v375_v3 = vld [vmem:[%s2147_s20 + $0x40] sm:$0xff]  ;;  %vm389_vm0 = vcmask 130048   ;;  %v378_v7 = vld [vmem:[%s2147_s20 + $0x58] sm:$0xff]  ;;  %v707_v55 = vlaneseq }
  0x4d   : > { %1928 = vsyncadd (%p2917_p8), [#allocation7], 4294966784  ;;  %457 = vmatprep.mubr.f32.mxu1 %v1955_v0  ;;  %1823 = vset.pattern.permute.xlu0 %v1956_v1  ;;  %v368_v4 = vld [vmem:[%s2147_s20 + $0x8] sm:$0xff]  ;;  %v367_v5 = vld [vmem:[%s2147_s20] sm:$0xff]  ;;  %s1957_s18 = smov 127   ;;  %s1958_s19 = smov 113  }
  0x4e   : > { %1824 = vset.pattern.permute.xlu1 %v1956_v1  ;;  %421 = vmatprep.subr.mxu1 %v376_v2  ;;  %v366_v6 = vld [vmem:[%s2873_s1] sm:$0xff]  ;;  %v377_v8 = vld [vmem:[%s2147_s20 + $0x50] sm:$0xff]  ;;  %v370_v9 = vld [vmem:[%s2147_s20 + $0x18] sm:$0xff]  ;;  %s1959_s16 = smov 1   ;;  %s1960_s26 = smov 15   ;;  %v2317_v57 = vand.u32 127, %v707_v55 }
  0x4f   : > { %422 = vmatpush1.msra.mxu1 %v375_v3  ;;  %v369_v10 = vld [vmem:[%s2147_s20 + $0x10] sm:$0xff]  ;;  %v383_v11 = vld [vmem:[%s2876_s4] sm:$0xff]  ;;  %v380_v12 = vld [vmem:[%s2147_s20 + $0x68] sm:$0xff]  ;;  %s1961_s28 = smov 16   ;;  %s1962_s3 = smov 17  }
  0x50   : > { %423 = vmatprep.subr.mxu1 %v368_v4  ;;  %v379_v13 = vld [vmem:[%s2147_s20 + $0x60] sm:$0xff]  ;;  %386 = vperm.xlu0 %1823, %v383_v11   ;;  %v372_v14 = vld [vmem:[%s2147_s20 + $0x28] sm:$0xff]  ;;  %v382_v17 = vld [vmem:[%s2147_s20 + $0x78] sm:$0xff]  ;;  %s1963_s24 = smov 2   ;;  %s1965_s15 = smov 32   ;;  %v709_v58 = vadd.s32 128, %v2317_v57 }
  0x51   : > { %424 = vmatpush1.msra.mxu1 %v367_v5  ;;  %v685_v15 = vld [vmem:[%s2877_s5] sm:$0xff]  ;;  %v381_v18 = vld [vmem:[%s2147_s20 + $0x70] sm:$0xff]  ;;  %v374_v19 = vld [vmem:[%s2147_s20 + $0x38] sm:$0xff]  ;;  %s1966_s17 = smov 34   ;;  %s1967_s27 = smov 112   ;;  %v2333_v62 = vshra.s32 %v2317_v57, 4 }
  0x52   : > { %1664 = vmatmul.mubr.msk.f32.vlgmr.msra.gmra.mxu1 %vm389_vm0, %v366_v6  ;;  %492 = vmatprep.subr.mxu1 %v378_v7  ;;  %v371_v16 = vld [vmem:[%s2147_s20 + $0x20] sm:$0xff]  ;;  %v373_v20 = vld [vmem:[%s2147_s20 + $0x30] sm:$0xff]  ;;  %s1964_s20 = smov 30   ;;  %s1968_s22 = smov 94   ;;  %v1073_v56 = vld [vmem:[%s2874_s2 + $0x8] sm:$0xff]  ;;  %v2328_v60 = vshra.s32 %v709_v58, 4 }
  0x53   : > { %493 = vmatpush1.msra.mxu1 %v377_v8  ;;  %528 = vmatprep.mubr.f32.mxu1 %v1955_v0  ;;  %s1969_s23 = smov 111   ;;  %s1970_s25 = smov 114   ;;  %v1159_v59 = vld [vmem:[%s2878_s6 + $0x18] sm:$0xff]  ;;  %v2330_v61 = vand.u32 15, %v709_v58  ;;  %v2336_v63 = vand.u32 15, %v2317_v57  ;;  %v1157_v1 = vld [vmem:[%s2878_s6 + $0x8] sm:$0xff] }
  0x54   : > { %494 = vmatprep.subr.mxu1 %v370_v9  ;;  %688 = vperm.xlu0 %1823, %v685_v15   ;;  %vm2892_vm10 = vcmp.lt.s32.totalorder %v2328_v60, 15  ;;  %vm2890_vm12 = vcmp.lt.s32.totalorder %v2333_v62, 15  ;;  %vm843_vm13 = vcmp.lt.s32.totalorder %v2317_v57, 113  ;;  %v1156_v4 = vld [vmem:[%s2878_s6] sm:$0xff]  ;;  %v1380_v9 = vld [vmem:[%s2879_s7 + $0x8] sm:$0xff]  ;;  %p2961_p11 = scmp.ne.s32.totalorder %s2912_s14, 0 }
  0x55   : > { %495 = vmatpush1.msra.mxu1 %v369_v10  ;;  %1257 = vmatprep.mubr.f32.mxu0 %v1073_v56  ;;  %vm724_vm9 = vcmp.ge.s32.totalorder %v2330_v61, 1  ;;  %vm723_vm11 = vcmp.ge.s32.totalorder %v2336_v63, 1 }
  0x56   : > { %1665 = vmatmul.mubr.msk.f32.vlgmr.msra.gmra.mxu1 %vm389_vm0, %v366_v6  ;;  %563 = vmatprep.subr.mxu1 %v380_v12  ;;  %vm849_vm14 = vmand %vm2892_vm10, %vm724_vm9 }
  0x57   : > { %564 = vmatpush1.msra.mxu1 %v379_v13  ;;  %599 = vmatprep.mubr.f32.mxu1 %v1955_v0  ;;  %vm848_vm15 = vmand %vm2890_vm12, %vm723_vm11  ;;  %vm1040_vm12 = vcmp.lt.s32.totalorder %v2333_v62, 14 }
  0x58   : > { %565 = vmatprep.subr.mxu1 %v372_v14  ;;  %v1423_v14 = vld [vmem:[%s2880_s8] sm:$0xff] }
  0x59   : > { %566 = vmatpush1.msra.mxu1 %v371_v16 }
  0x5a   : > { %1666 = vmatmul.mubr.msk.f32.vlgmr.msra.gmra.mxu1 %vm389_vm0, %v366_v6  ;;  %634 = vmatprep.subr.mxu1 %v382_v17 }
  0x5b   : > { %635 = vmatpush1.msra.mxu1 %v381_v18  ;;  %670 = vmatprep.mubr.f32.mxu1 %v1955_v0 }
  0x5c   : > { %636 = vmatprep.subr.mxu1 %v374_v19  ;;  %v1158_v19 = vld [vmem:[%s2878_s6 + $0x10] sm:$0xff] }
  0x5d   : > { %637 = vmatpush1.msra.mxu1 %v373_v20  ;;  %v1425_v20 = vld [vmem:[%s2880_s8 + $0x10] sm:$0xff] }
  0x5e   : > { %1667 = vmatmul.mubr.msk.f32.vlgmr.msra.gmra.mxu1 %vm389_vm0, %v366_v6  ;;  %vm2889_vm0 = vcmp.lt.s32.totalorder %v2317_v57, 127 }
  0x5f   : > { %1346 = vmatprep.mubr.f32.mxu1 %v1955_v0 }
  0xcb   : > { %v2191_v21 = vpop.permute.xlu0 %386 }
  0xcf   : > { %v2194_v24 = vpop.permute.xlu0 %688 }
 0x112   : > { %v459_v22 = vpop.f32.mrf.mxu1 }
 0x113   : > { %v460_v23 = vadd.f32 %v459_v22, %v2191_v21 }
 0x114   : > { %v461_v25 = vpop.f32.mrf.mxu1 }
 0x115   : > { %vm677_vm1 = vcmp.ge.f32.partialorder %v460_v23, 0.0  ;;  %v691_v26 = vmul.f32 %v2194_v24, %v460_v23  ;;  %v462_v27 = vadd.f32 %v461_v25, %v2191_v21 }
 0x116   : > { %v530_v31 = vpop.f32.mrf.mxu1 }
 0x117   : > { %v2198_v28 = vsel %vm677_vm1, %v460_v23, %v691_v26  ;;  %v692_v29 = vmul.f32 %v2194_v24, %v462_v27  ;;  %vm678_vm2 = vcmp.ge.f32.partialorder %v462_v27, 0.0  ;;  %v531_v32 = vadd.f32 %v530_v31, %v2191_v21  ;;  %v1382_v23 = vld [vmem:[%s2879_s7 + $0x18] sm:$0xff] }
 0x118   : > { %828 = vrot.lane.b32.xlu0 %v2198_v28, %s1957_s18  ;;  %839 = vrot.lane.b32.xlu1 %v2198_v28, %s1958_s19  ;;  %v532_v34 = vpop.f32.mrf.mxu1  ;;  %vm2893_vm1 = vcmp.lt.s32.totalorder %v2330_v61, 15 }
 0x119   : > { %v2204_v30 = vsel %vm678_vm2, %v462_v27, %v692_v29  ;;  %v693_v33 = vmul.f32 %v2194_v24, %v531_v32  ;;  %vm679_vm3 = vcmp.ge.f32.partialorder %v531_v32, 0.0  ;;  %v533_v35 = vadd.f32 %v532_v34, %v2191_v21  ;;  %v1381_v29 = vld [vmem:[%s2879_s7 + $0x10] sm:$0xff] }
 0x11a   : > { %v601_v37 = vpop.f32.mrf.mxu1  ;;  %vm2891_vm2 = vcmp.lt.s32.totalorder %v2336_v63, 15 }
 0x11b   : > { %v2236_v36 = vsel %vm679_vm3, %v531_v32, %v693_v33  ;;  %v694_v38 = vmul.f32 %v2194_v24, %v533_v35  ;;  %v602_v39 = vadd.f32 %v601_v37, %v2191_v21  ;;  %vm680_vm4 = vcmp.ge.f32.partialorder %v533_v35, 0.0 }
 0x11c   : > { %816 = vrot.lane.b32.xlu0 %v2198_v28, %s1959_s16  ;;  %841 = vrot.lane.b32.xlu1 %v2204_v30, %s1958_s19  ;;  %v603_v42 = vpop.f32.mrf.mxu1  ;;  %s1972_s19 = smov 96   ;;  %vm756_vm3 = vcmp.lt.s32.totalorder %v2317_v57, 1 }
 0x11d   : > { %v695_v40 = vmul.f32 %v2194_v24, %v602_v39  ;;  %v2249_v41 = vsel %vm680_vm4, %v533_v35, %v694_v38  ;;  %vm681_vm5 = vcmp.ge.f32.partialorder %v602_v39, 0.0  ;;  %v604_v43 = vadd.f32 %v603_v42, %v2191_v21  ;;  %v1379_v38 = vld [vmem:[%s2879_s7] sm:$0xff] }
 0x11e   : > { %v672_v45 = vpop.f32.mrf.mxu1  ;;  %vm722_vm4 = vcmp.ge.s32.totalorder %v2328_v60, 1 }
 0x11f   : > { %v2256_v44 = vsel %vm681_vm5, %v602_v39, %v695_v40  ;;  %v696_v46 = vmul.f32 %v2194_v24, %v604_v43  ;;  %v673_v47 = vadd.f32 %v672_v45, %v2191_v21  ;;  %vm682_vm6 = vcmp.ge.f32.partialorder %v604_v43, 0.0  ;;  %v1424_v45 = vld [vmem:[%s2880_s8 + $0x8] sm:$0xff] }
 0x120   : > { %801 = vrot.lane.b32.xlu0 %v2198_v28, %s1960_s26  ;;  %830 = vrot.lane.b32.xlu1 %v2204_v30, %s1957_s18  ;;  %v674_v50 = vpop.f32.mrf.mxu1  ;;  %vm721_vm5 = vcmp.ge.s32.totalorder %v2333_v62, 1 }
 0x121   : > { %v697_v48 = vmul.f32 %v2194_v24, %v673_v47  ;;  %v2269_v49 = vsel %vm682_vm6, %v604_v43, %v696_v46  ;;  %vm683_vm7 = vcmp.ge.f32.partialorder %v673_v47, 0.0  ;;  %v675_v52 = vadd.f32 %v674_v50, %v2191_v21 }
 0x122   : > { %vm805_vm6 = vcmp.lt.s32.totalorder %v2317_v57, 15 }
 0x123   : > { %v2275_v51 = vsel %vm683_vm7, %v673_v47, %v697_v48  ;;  %v698_v53 = vmul.f32 %v2194_v24, %v675_v52  ;;  %vm684_vm8 = vcmp.ge.f32.partialorder %v675_v52, 0.0  ;;  %vm811_vm7 = vmand %vm722_vm4, %vm2893_vm1  ;;  %v1426_v48 = vld [vmem:[%s2880_s8 + $0x18] sm:$0xff] }
 0x124   : > { %791 = vrot.lane.b32.xlu0 %v2198_v28, %s1961_s28  ;;  %818 = vrot.lane.b32.xlu1 %v2204_v30, %s1959_s16 }
 0x125   : > { %v2286_v54 = vsel %vm684_vm8, %v675_v52, %v698_v53  ;;  %vm810_vm8 = vmand %vm721_vm5, %vm2891_vm2 }
 0x128   : > { %781 = vrot.lane.b32.xlu0 %v2198_v28, %s1962_s3  ;;  %803 = vrot.lane.b32.xlu1 %v2204_v30, %s1960_s26  ;;  %s1682_s26 = sshll.u32 %s2048_s13, 10  ;;  %s1975_s13 = smov [#allocation8]  }
 0x12c   : > { %1010 = vrot.lane.b32.xlu0 %v2198_v28, %s1963_s24  ;;  %793 = vrot.lane.b32.xlu1 %v2204_v30, %s1961_s28 }
 0x130   : > { %995 = vrot.lane.b32.xlu0 %v2198_v28, %s1964_s20  ;;  %783 = vrot.lane.b32.xlu1 %v2204_v30, %s1962_s3 }
 0x134   : > { %985 = vrot.lane.b32.xlu0 %v2198_v28, %s1965_s15  ;;  %1012 = vrot.lane.b32.xlu1 %v2204_v30, %s1963_s24 }
 0x138   : > { %975 = vrot.lane.b32.xlu0 %v2198_v28, %s1966_s17  ;;  %997 = vrot.lane.b32.xlu1 %v2204_v30, %s1964_s20  ;;  %s2828_s20 = scalar_lea.hbm %s2881_s9, %s1682_s26 }
 0x13c   : > { %752 = vrot.lane.b32.xlu0 %v2236_v36, %s1959_s16  ;;  %987 = vrot.lane.b32.xlu1 %v2204_v30, %s1965_s15 }
 0x140   : > { %932 = vrot.lane.b32.xlu0 %v2236_v36, %s1957_s18  ;;  %977 = vrot.lane.b32.xlu1 %v2204_v30, %s1966_s17 }
 0x144   : > { %919 = vrot.lane.b32.xlu0 %v2236_v36, %s1963_s24  ;;  %754 = vrot.lane.b32.xlu1 %v2249_v41, %s1959_s16 }
 0x148   : > { %731 = vrot.lane.b32.xlu0 %v2256_v44, %s1961_s28  ;;  %934 = vrot.lane.b32.xlu1 %v2249_v41, %s1957_s18  ;;  %s1971_s18 = smov 31  }
 0x14c   : > { %955 = vrot.lane.b32.xlu0 %v2256_v44, %s1967_s27  ;;  %921 = vrot.lane.b32.xlu1 %v2249_v41, %s1963_s24  ;;  %s1974_s24 = smov 126  }
 0x150   : > { %895 = vrot.lane.b32.xlu0 %v2256_v44, %s1965_s15  ;;  %733 = vrot.lane.b32.xlu1 %v2269_v49, %s1961_s28 }
 0x154   : > { %767 = vrot.lane.b32.xlu0 %v2275_v51, %s1959_s16  ;;  %957 = vrot.lane.b32.xlu1 %v2269_v49, %s1967_s27 }
 0x158   : > { %1059 = vrot.lane.b32.xlu0 %v2198_v28, %s1968_s22  ;;  %897 = vrot.lane.b32.xlu1 %v2269_v49, %s1965_s15  ;;  %s1557_s15 = scalar_lea.sflag [#allocation5], %s2143_s21 }
 0x15c   : > { %742 = vrot.lane.b32.xlu0 %v2275_v51, %s1961_s28  ;;  %769 = vrot.lane.b32.xlu1 %v2286_v54, %s1959_s16 }
 0x160   : > { %714 = vrot.lane.b32.xlu0 %v2275_v51, %s1962_s3  ;;  %1061 = vrot.lane.b32.xlu1 %v2204_v30, %s1968_s22  ;;  %s1883_s22 = sshll.u32 %s1975_s13, 4  ;;  %s1884_s22 = int_to_ptr.vmem [resolvable:$false] %s1883_s22 }
 0x164   : > { %965 = vrot.lane.b32.xlu0 %v2275_v51, %s1969_s23  ;;  %744 = vrot.lane.b32.xlu1 %v2286_v54, %s1961_s28 }
 0x168   : > { %942 = vrot.lane.b32.xlu0 %v2275_v51, %s1970_s25  ;;  %716 = vrot.lane.b32.xlu1 %v2286_v54, %s1962_s3  ;;  %s1973_s3 = smov 98  }
 0x16c   : > { %906 = vrot.lane.b32.xlu0 %v2275_v51, %s1971_s18  ;;  %867 = vrot.lane.b32.xlu1 %v2204_v30, %s1969_s23 }
 0x170   : > { %878 = vrot.lane.b32.xlu0 %v2275_v51, %s1966_s17  ;;  %1050 = vrot.lane.b32.xlu1 %v2204_v30, %s1972_s19 }
 0x174   : > { %865 = vrot.lane.b32.xlu0 %v2198_v28, %s1969_s23  ;;  %967 = vrot.lane.b32.xlu1 %v2286_v54, %s1969_s23 }
 0x178   : > { %1048 = vrot.lane.b32.xlu0 %v2198_v28, %s1972_s19  ;;  %944 = vrot.lane.b32.xlu1 %v2286_v54, %s1970_s25 }
 0x17c   : > { %854 = vrot.lane.b32.xlu0 %v2198_v28, %s1967_s27  ;;  %856 = vrot.lane.b32.xlu1 %v2204_v30, %s1967_s27 }
 0x180   : > { %1033 = vrot.lane.b32.xlu0 %v2198_v28, %s1973_s3  ;;  %908 = vrot.lane.b32.xlu1 %v2286_v54, %s1971_s18  ;;  %s1663_s18 = sshll.u32 %s2143_s21, 6 }
 0x181   : > { %s365_s19 = scalar_lea.vmem [#allocation8], %s1663_s18 }
 0x182   : > { %s1570_s16 = sshll.u32 %s365_s19, 4  ;;  %s2823_s16 = int_to_ptr.vmem [resolvable:$true] %s1570_s16 }
 0x183   : > { %s1879_s27 = scalar_lea.vmem %s2823_s16, 1024  ;;  %p1886_p10 = scmp.lt.s32.totalorder %s2823_s16, %s1884_s22 }
 0x184   : > { %1022 = vrot.lane.b32.xlu0 %v2198_v28, %s1974_s24  ;;  %880 = vrot.lane.b32.xlu1 %v2286_v54, %s1966_s17  ;;  %p1880_p3 = scmp.ne.s32.totalorder %s2823_s16, %s1879_s27  ;;  %s1885_s17 = scalar_lea.vmem %s1884_s22, 2048 }
 0x185   : > { %p1887_p2 = scmp.lt.s32.totalorder %s1885_s17, %s1879_s27 }
 0x186   : > { %p1881_p7 = pnand %p1880_p3, %p2961_p11 }
 0x187   : > { %p1888_p13 = por %p1887_p2, %p1886_p10 }
 0x188   : > { %1177 = vperm.xlu0 %1823, %v1159_v59   ;;  %1035 = vrot.lane.b32.xlu1 %v2204_v30, %s1973_s3  ;;  %p1882_p12 = pneg %p1881_p7 }
 0x18a   : > { %v829_v2 = vpop.permute.xlu0 %828  ;;  %v840_v3 = vpop.permute.xlu1 %839  ;;  %p1889_p0 = pnand %p1888_p13, %p1882_p12 }
 0x18c   : > { %1167 = vperm.xlu0 %1823, %v1157_v1   ;;  %1024 = vrot.lane.b32.xlu1 %v2204_v30, %s1974_s24 }
 0x18e   : > { %v817_v5 = vpop.permute.xlu0 %816  ;;  %v842_v6 = vpop.permute.xlu1 %841 }
 0x18f   : > { %v845_v7 = vsel %vm843_vm13, %v842_v6, %v840_v3  ;;  %v844_v8 = vsel %vm843_vm13, %v840_v3, %v842_v6  ;;  %vm735_vm13 = vcmp.lt.s32.totalorder %v2317_v57, 16 }
 0x190   : > { %1162 = vperm.xlu0 %1823, %v1156_v4   ;;  %1683 = vmatprep.subr.msk.mxu0 %vm849_vm14, %v845_v7  ;;  %vm718_vm14 = vcmp.lt.s32.totalorder %v2317_v57, 17 }
 0x191   : > { %1684 = vmatpush1.msk.msra.mxu0 %vm848_vm15, %v844_v8  ;;  %1172 = vperm.xlu1 %1824, %v1158_v19   ;;  %vm2426_vm15 = vmand %vm722_vm4, %vm724_vm9 }
 0x192   : > { %v802_v10 = vpop.permute.xlu0 %801  ;;  %v831_v11 = vpop.permute.xlu1 %830 }
 0x193   : > { %v833_v12 = vsel %vm2889_vm0, %v829_v2, %v831_v11  ;;  %v834_v13 = vsel %vm2889_vm0, %v831_v11, %v829_v2  ;;  %vm2894_vm0 = vcmp.lt.s32.totalorder %v2336_v63, 14 }
 0x194   : > { %1390 = vperm.xlu0 %1823, %v1380_v9   ;;  %1685 = vmatprep.subr.msk.mxu0 %vm2893_vm1, %v834_v13  ;;  %vm1066_vm1 = vmand %vm1040_vm12, %vm2894_vm0 }
 0x195   : > { %1686 = vmatpush1.msk.msra.mxu0 %vm2891_vm2, %v833_v12  ;;  %1400 = vperm.xlu1 %1824, %v1382_v23   ;;  %vm1063_vm2 = vcmp.lt.s32.totalorder %v2317_v57, 94 }
 0x196   : > { %v792_v15 = vpop.permute.xlu0 %791  ;;  %1197 = vmatprep.subr.mxu0 %v2204_v30  ;;  %v819_v16 = vpop.permute.xlu1 %818 }
 0x197   : > { %v820_v17 = vsel %vm756_vm3, %v817_v5, %v819_v16  ;;  %v821_v18 = vsel %vm756_vm3, %v819_v16, %v817_v5  ;;  %1198 = vmatpush1.msra.mxu0 %v2198_v28 }
 0x198   : > { %1429 = vperm.xlu0 %1823, %v1423_v14   ;;  %1687 = vmatprep.subr.msk.mxu0 %vm724_vm9, %v820_v17 }
 0x199   : > { %1688 = vmatpush1.msk.msra.mxu0 %vm723_vm11, %v821_v18  ;;  %1395 = vperm.xlu1 %1824, %v1381_v29  }
 0x19a   : > { %v782_v21 = vpop.permute.xlu0 %781  ;;  %v804_v22 = vpop.permute.xlu1 %803 }
 0x19b   : > { %v806_v24 = vsel %vm805_vm6, %v802_v10, %v804_v22  ;;  %v807_v25 = vsel %vm805_vm6, %v804_v22, %v802_v10  ;;  %vm2436_vm6 = vmand %vm721_vm5, %vm723_vm11 }
 0x19c   : > { %1439 = vperm.xlu0 %1823, %v1425_v20   ;;  %1689 = vmatprep.subr.msk.mxu0 %vm811_vm7, %v806_v24  ;;  %vm2895_vm7 = vcmp.lt.s32.totalorder %v2330_v61, 14 }
 0x19d   : > { %1690 = vmatpush1.msk.msra.mxu0 %vm810_vm8, %v807_v25  ;;  %1385 = vperm.xlu1 %1824, %v1379_v38   ;;  %vm1041_vm8 = vcmp.lt.s32.totalorder %v2328_v60, 14 }
 0x19e   : > { %v2408_v26 = vpop.permute.xlu0 %1010  ;;  %v794_v27 = vpop.permute.xlu1 %793  ;;  %vm1067_vm10 = vmand %vm1041_vm8, %vm2895_vm7 }
 0x19f   : > { %v795_v31 = vsel %vm735_vm13, %v792_v15, %v794_v27  ;;  %v796_v32 = vsel %vm735_vm13, %v794_v27, %v792_v15 }
 0x1a0   : > { %1691 = vmatprep.subr.msk.mxu0 %vm722_vm4, %v795_v31 }
 0x1a1   : > { %1692 = vmatpush1.msk.msra.mxu0 %vm721_vm5, %v796_v32  ;;  %1434 = vperm.xlu1 %1824, %v1424_v45  }
 0x1a2   : > { %v2430_v34 = vpop.permute.xlu0 %995  ;;  %v784_v35 = vpop.permute.xlu1 %783 }
 0x1a3   : > { %v785_v39 = vsel %vm718_vm14, %v782_v21, %v784_v35  ;;  %v786_v40 = vsel %vm718_vm14, %v784_v35, %v782_v21 }
 0x1a4   : > { %1693 = vmatprep.subr.msk.mxu0 %vm2426_vm15, %v785_v39 }
 0x1a5   : > { %1694 = vmatpush1.msk.msra.mxu0 %vm2436_vm6, %v786_v40  ;;  %1444 = vperm.xlu1 %1824, %v1426_v48  }
 0x1a6   : > { %v2451_v42 = vpop.permute.xlu0 %985  ;;  %1207 = vmatprep.subr.mxu0 %v2286_v54  ;;  %v2454_v43 = vpop.permute.xlu1 %1012 }
 0x1a7   : > { %1208 = vmatpush1.msra.mxu0 %v2275_v51 }
 0x1a8   : > { %1209 = vmatprep.subr.mxu0 %v2269_v49 }
 0x1a9   : > { %1210 = vmatpush1.msra.mxu0 %v2256_v44 }
 0x1aa   : > { %v2462_v46 = vpop.permute.xlu0 %975  ;;  %v2464_v47 = vpop.permute.xlu1 %997 }
 0x1ae   : > { %v753_v50 = vpop.permute.xlu0 %752  ;;  %v2469_v52 = vpop.permute.xlu1 %987 }
 0x1b2   : > { %v2471_v53 = vpop.permute.xlu0 %932  ;;  %v2473_v51 = vpop.permute.xlu1 %977 }
 0x1b6   : > { %v2475_v49 = vpop.permute.xlu0 %919  ;;  %v755_v44 = vpop.permute.xlu1 %754 }
 0x1b7   : > { %v757_v14 = vsel %vm756_vm3, %v753_v50, %v755_v44 }
 0x1ba   : > { %v732_v54 = vpop.permute.xlu0 %731  ;;  %v2477_v55 = vpop.permute.xlu1 %934 }
 0x1be   : > { %v2479_v56 = vpop.permute.xlu0 %955  ;;  %v2481_v58 = vpop.permute.xlu1 %921 }
 0x1c2   : > { %v2483_v59 = vpop.permute.xlu0 %895  ;;  %v734_v1 = vpop.permute.xlu1 %733 }
 0x1c3   : > { %v736_v18 = vsel %vm735_vm13, %v732_v54, %v734_v1  ;;  %v737_v19 = vsel %vm735_vm13, %v734_v1, %v732_v54 }
 0x1c6   : > { %v768_v2 = vpop.permute.xlu0 %767  ;;  %v2485_v3 = vpop.permute.xlu1 %957 }
 0x1ca   : > { %v1060_v4 = vpop.permute.xlu0 %1059  ;;  %v2487_v5 = vpop.permute.xlu1 %897 }
 0x1ce   : > { %v743_v6 = vpop.permute.xlu0 %742  ;;  %v770_v7 = vpop.permute.xlu1 %769 }
 0x1cf   : > { %v771_v8 = vsel %vm756_vm3, %v768_v2, %v770_v7  ;;  %v772_v9 = vsel %vm756_vm3, %v770_v7, %v768_v2 }
 0x1d0   : > { %1695 = vmatprep.subr.msk.mxu0 %vm724_vm9, %v771_v8 }
 0x1d1   : > { %1696 = vmatpush1.msk.msra.mxu0 %vm723_vm11, %v772_v9 }
 0x1d2   : > { %v715_v10 = vpop.permute.xlu0 %714  ;;  %1213 = vmatprep.subr.mxu0 %v2249_v41  ;;  %v1062_v11 = vpop.permute.xlu1 %1061  ;;  %v758_v41 = vsel %vm756_vm3, %v755_v44, %v753_v50  ;;  %vm887_vm3 = vcmp.ge.s32.totalorder %v2336_v63, 2 }
 0x1d3   : > { %v1064_v12 = vsel %vm1063_vm2, %v1060_v4, %v1062_v11  ;;  %v1065_v13 = vsel %vm1063_vm2, %v1062_v11, %v1060_v4  ;;  %1214 = vmatpush1.msra.mxu0 %v2236_v36  ;;  %vm999_vm2 = vcmp.lt.s32.totalorder %v2317_v57, 30 }
 0x1d4   : > { %1215 = vmatprep.subr.mxu0 %v2204_v30  ;;  %1733 = vmatprep.subr.msk.mxu1 %vm1067_vm10, %v1065_v13  ;;  %vm2900_vm10 = vcmp.ge.s32.totalorder %v2328_v60, 2  ;;  %v1000_v31 = vsel %vm999_vm2, %v2430_v34, %v2464_v47  ;;  %v1001_v32 = vsel %vm999_vm2, %v2464_v47, %v2430_v34 }
 0x1d5   : > { %1216 = vmatpush1.msra.mxu0 %v2198_v28  ;;  %1734 = vmatpush1.msk.msra.mxu1 %vm1066_vm1, %v1064_v12  ;;  %vm2897_vm1 = vcmp.ge.s32.totalorder %v2333_v62, 2 }
 0x1d6   : > { %v966_v15 = vpop.permute.xlu0 %965  ;;  %1697 = vmatprep.subr.msk.mxu0 %vm724_vm9, %v757_v14  ;;  %v745_v16 = vpop.permute.xlu1 %744  ;;  %vm2901_vm9 = vcmp.lt.s32.totalorder %v2317_v57, 2  ;;  %vm2611_vm2 = vmand %vm2897_vm1, %vm887_vm3 }
 0x1d7   : > { %v746_v36 = vsel %vm735_vm13, %v743_v6, %v745_v16  ;;  %v747_v17 = vsel %vm735_vm13, %v745_v16, %v743_v6  ;;  %1698 = vmatpush1.msk.msra.mxu0 %vm723_vm11, %v758_v41  ;;  %vm888_vm11 = vcmp.ge.s32.totalorder %v2330_v61, 2  ;;  %v1014_v27 = vsel %vm2901_vm9, %v2408_v26, %v2454_v43  ;;  %vm1004_vm13 = vmand %vm2897_vm1, %vm2894_vm0  ;;  %v1072_v16 = vld [vmem:[%s2874_s2] sm:$0xff] }
 0x1d8   : > { %1699 = vmatprep.subr.msk.mxu0 %vm722_vm4, %v746_v36  ;;  %v1015_v29 = vsel %vm2901_vm9, %v2454_v43, %v2408_v26 }
 0x1d9   : > { %1700 = vmatpush1.msk.msra.mxu0 %vm721_vm5, %v747_v17  ;;  %v1076_v17 = vld [vmem:[%s2874_s2 + $0x20] sm:$0xff] }
 0x1da   : > { %v2534_v20 = vpop.permute.xlu0 %942  ;;  %1701 = vmatprep.subr.msk.mxu0 %vm722_vm4, %v736_v18  ;;  %v717_v21 = vpop.permute.xlu1 %716  ;;  %vm1005_vm4 = vmand %vm2900_vm10, %vm2895_vm7  ;;  %vm2902_vm7 = vcmp.lt.s32.totalorder %v2317_v57, 112 }
 0x1db   : > { %v719_v22 = vsel %vm718_vm14, %v715_v10, %v717_v21  ;;  %v720_v23 = vsel %vm718_vm14, %v717_v21, %v715_v10  ;;  %1702 = vmatpush1.msk.msra.mxu0 %vm721_vm5, %v737_v19  ;;  %vm2896_vm5 = vcmp.lt.s32.totalorder %v2317_v57, 32  ;;  %vm2898_vm14 = vcmp.lt.s32.totalorder %v2317_v57, 34 }
 0x1dc   : > { %1703 = vmatprep.subr.msk.mxu0 %vm2426_vm15, %v719_v22  ;;  %v989_v35 = vsel %vm2896_vm5, %v2451_v42, %v2469_v52  ;;  %vm2596_vm15 = vmand %vm2900_vm10, %vm888_vm11  ;;  %v990_v34 = vsel %vm2896_vm5, %v2469_v52, %v2451_v42  ;;  %v979_v39 = vsel %vm2898_vm14, %v2462_v46, %v2473_v51  ;;  %v980_v42 = vsel %vm2898_vm14, %v2473_v51, %v2462_v46  ;;  %v1078_v22 = vld [vmem:[%s2874_s2 + $0x30] sm:$0xff] }
 0x1dd   : > { %1704 = vmatpush1.msk.msra.mxu0 %vm2436_vm6, %v720_v23  ;;  %vm2899_vm6 = vcmp.lt.s32.totalorder %v2317_v57, 111  ;;  %vm2930_vm5 = vcmp.lt.s32.totalorder %v2336_v63, 15  ;;  %vm946_vm14 = vcmp.lt.s32.totalorder %v2317_v57, 114  ;;  %v960_v50 = vsel %vm2902_vm7, %v2485_v3, %v2479_v56  ;;  %v1082_v23 = vld [vmem:[%s2874_s2 + $0x50] sm:$0xff] }
 0x1de   : > { %v2553_v24 = vpop.permute.xlu0 %906  ;;  %1225 = vmatprep.subr.mxu0 %v2204_v30  ;;  %v2556_v25 = vpop.permute.xlu1 %867  ;;  %v959_v52 = vsel %vm2902_vm7, %v2479_v56, %v2485_v3 }
 0x1df   : > { %1226 = vmatpush2.msra.mxu0 %v2198_v28 }
 0x1e0   : > { %1705 = vmatprep.subr.msk.mxu0 %vm888_vm11, %v1014_v27 }
 0x1e1   : > { %1706 = vmatpush2.msk.msra.mxu0 %vm887_vm3, %v1015_v29 }
 0x1e2   : > { %v2586_v26 = vpop.permute.xlu0 %878  ;;  %1707 = vmatprep.subr.msk.mxu0 %vm1005_vm4, %v1000_v31  ;;  %v1051_v33 = vpop.permute.xlu1 %1050  ;;  %vm2926_vm4 = vcmp.lt.s32.totalorder %v2330_v61, 15 }
 0x1e3   : > { %1708 = vmatpush2.msk.msra.mxu0 %vm1004_vm13, %v1001_v32  ;;  %vm2927_vm13 = vcmp.lt.s32.totalorder %v2328_v60, 15 }
 0x1e4   : > { %1709 = vmatprep.subr.msk.mxu0 %vm2900_vm10, %v989_v35  ;;  %vm2625_vm0 = vmand %vm2927_vm13, %vm2926_vm4  ;;  %vm1052_vm13 = vcmp.lt.s32.totalorder %v2317_v57, 96  ;;  %vm2936_vm10 = vcmp.lt.s32.totalorder %v2333_v62, 15 }
 0x1e5   : > { %1710 = vmatpush2.msk.msra.mxu0 %vm2897_vm1, %v990_v34  ;;  %vm2931_vm1 = vcmp.lt.s32.totalorder %v2333_v62, 15  ;;  %vm949_vm9 = vmand %vm2936_vm10, %vm887_vm3 }
 0x1e6   : > { %v866_v43 = vpop.permute.xlu0 %865  ;;  %1711 = vmatprep.subr.msk.mxu0 %vm2596_vm15, %v979_v39  ;;  %v968_v45 = vpop.permute.xlu1 %967  ;;  %vm2640_vm4 = vmand %vm2931_vm1, %vm2930_vm5  ;;  %vm2934_vm1 = vcmp.lt.s32.totalorder %v2328_v60, 15 }
 0x1e7   : > { %v969_v48 = vsel %vm2899_vm6, %v966_v15, %v968_v45  ;;  %v970_v46 = vsel %vm2899_vm6, %v968_v45, %v966_v15  ;;  %1712 = vmatpush2.msk.msra.mxu0 %vm2611_vm2, %v980_v42  ;;  %vm950_vm5 = vmand %vm2934_vm1, %vm888_vm11 }
 0x1e8   : > { %1713 = vmatprep.subr.msk.mxu0 %vm2625_vm0, %v970_v46  ;;  %vm2935_vm6 = vmmov %vm2934_vm1 }
 0x1e9   : > { %1714 = vmatpush2.msk.msra.mxu0 %vm2640_vm4, %v969_v48  ;;  %vm2937_vm1 = vmmov %vm2936_vm10 }
 0x1ea   : > { %v1049_v51 = vpop.permute.xlu0 %1048  ;;  %1715 = vmatprep.subr.msk.mxu0 %vm2935_vm6, %v960_v50  ;;  %v945_v44 = vpop.permute.xlu1 %944  ;;  %vm2938_vm6 = vcmp.lt.s32.totalorder %v2317_v57, 127 }
 0x1eb   : > { %v1053_v54 = vsel %vm1052_vm13, %v1049_v51, %v1051_v33  ;;  %v1054_v1 = vsel %vm1052_vm13, %v1051_v33, %v1049_v51  ;;  %v947_v2 = vsel %vm946_vm14, %v2534_v20, %v945_v44  ;;  %v948_v4 = vsel %vm946_vm14, %v945_v44, %v2534_v20  ;;  %1716 = vmatpush2.msk.msra.mxu0 %vm2937_vm1, %v959_v52  ;;  %vm2939_vm10 = vmmov %vm2938_vm6 }
 0x1ec   : > { %1717 = vmatprep.subr.msk.mxu0 %vm950_vm5, %v948_v4  ;;  %1735 = vmatprep.subr.msk.mxu1 %vm1041_vm8, %v1054_v1  ;;  %v937_v56 = vsel %vm2938_vm6, %v2477_v55, %v2471_v53  ;;  %v936_v3 = vsel %vm2939_vm10, %v2471_v53, %v2477_v55  ;;  %vm2940_vm14 = vcmp.lt.s32.totalorder %v2330_v61, 15  ;;  %vm2941_vm13 = vcmp.lt.s32.totalorder %v2336_v63, 15 }
 0x1ed   : > { %1718 = vmatpush2.msk.msra.mxu0 %vm949_vm9, %v947_v2  ;;  %1736 = vmatpush1.msk.msra.mxu1 %vm1040_vm12, %v1053_v54  ;;  %vm910_vm5 = vcmp.lt.s32.totalorder %v2317_v57, 31  ;;  %vm2942_vm9 = vcmp.lt.s32.totalorder %v2317_v57, 2  ;;  %vm2943_vm1 = vmmov %vm2940_vm14  ;;  %vm2944_vm6 = vcmp.ge.s32.totalorder %v2328_v60, 2 }
 0x1ee   : > { %1719 = vmatprep.subr.msk.mxu0 %vm2940_vm14, %v937_v56  ;;  %v857_v6 = vpop.permute.xlu1 %856  ;;  %v924_v7 = vsel %vm2942_vm9, %v2475_v49, %v2481_v58  ;;  %vm914_vm10 = vmand %vm2944_vm6, %vm2943_vm1  ;;  %vm2947_vm1 = vcmp.lt.s32.totalorder %v2317_v57, 32 }
 0x1ef   : > { %1720 = vmatpush2.msk.msra.mxu0 %vm2941_vm13, %v936_v3  ;;  %vm2945_vm14 = vmmov %vm2942_vm9  ;;  %vm2946_vm9 = vcmp.ge.s32.totalorder %v2333_v62, 2 }
 0x1f0   : > { %1243 = vmatprep.subr.mxu0 %v2204_v30  ;;  %v925_v53 = vsel %vm2945_vm14, %v2481_v58, %v2475_v49  ;;  %v855_v30 = vpop.permute.xlu0 %854  ;;  %vm913_vm7 = vmand %vm2946_vm9, %vm2941_vm13  ;;  %v900_v49 = vsel %vm2947_vm1, %v2483_v59, %v2487_v5  ;;  %vm2949_vm14 = vcmp.ge.s32.totalorder %v2328_v60, 2 }
 0x1f1   : > { %1244 = vmatpush2.msra.mxu0 %v2198_v28  ;;  %vm2948_vm6 = vmmov %vm2947_vm1 }
 0x1f2   : > { %1721 = vmatprep.subr.msk.mxu0 %vm888_vm11, %v924_v7  ;;  %v909_v55 = vpop.permute.xlu1 %908  ;;  %v901_v58 = vsel %vm2948_vm6, %v2487_v5, %v2483_v59  ;;  %vm2952_vm13 = vmmov %vm2946_vm9  ;;  %vm2953_vm9 = vcmp.lt.s32.totalorder %v2317_v57, 111 }
 0x1f3   : > { %v911_v28 = vsel %vm910_vm5, %v2553_v24, %v909_v55  ;;  %v912_v8 = vsel %vm910_vm5, %v909_v55, %v2553_v24  ;;  %1722 = vmatpush2.msk.msra.mxu0 %vm887_vm3, %v925_v53  ;;  %vm2950_vm5 = vcmp.lt.s32.totalorder %v2317_v57, 34  ;;  %v871_v59 = vsel %vm2953_vm9, %v2556_v25, %v866_v43  ;;  %vm1043_vm1 = vmand %vm1041_vm8, %vm888_vm11  ;;  %v1080_v24 = vld [vmem:[%s2874_s2 + $0x40] sm:$0xff] }
 0x1f4   : > { %1723 = vmatprep.subr.msk.mxu0 %vm914_vm10, %v911_v28  ;;  %vm2951_vm10 = vmmov %vm2950_vm5  ;;  %v1034_v12 = vpop.permute.xlu0 %1033  ;;  %vm2957_vm8 = vcmp.lt.s32.totalorder %v2328_v60, 15  ;;  %vm2958_vm11 = vcmp.lt.s32.totalorder %v2333_v62, 15  ;;  %v1075_v60 = vld [vmem:[%s2874_s2 + $0x18] sm:$0xff] }
 0x1f5   : > { %1724 = vmatpush2.msk.msra.mxu0 %vm913_vm7, %v912_v8  ;;  %vm1037_vm7 = vcmp.lt.s32.totalorder %v2317_v57, 98  ;;  %vm2954_vm6 = vmmov %vm2953_vm9  ;;  %v1079_v62 = vld [vmem:[%s2874_s2 + $0x38] sm:$0xff] }
 0x1f6   : > { %1725 = vmatprep.subr.msk.mxu0 %vm2949_vm14, %v900_v49  ;;  %v881_v9 = vpop.permute.xlu1 %880  ;;  %v870_v5 = vsel %vm2954_vm6, %v866_v43, %v2556_v25  ;;  %vm2960_vm14 = vcmp.lt.s32.totalorder %v2336_v63, 14  ;;  %v1081_v63 = vld [vmem:[%s2874_s2 + $0x48] sm:$0xff]  ;;  %v1083_v25 = vld [vmem:[%s2874_s2 + $0x58] sm:$0xff] }
 0x1f7   : > { %v883_v10 = vsel %vm2950_vm5, %v2586_v26, %v881_v9  ;;  %v884_v11 = vsel %vm2951_vm10, %v881_v9, %v2586_v26  ;;  %1726 = vmatpush2.msk.msra.mxu0 %vm2952_vm13, %v901_v58 }
 0x1f8   : > { %1727 = vmatprep.subr.msk.mxu0 %vm2596_vm15, %v883_v10  ;;  %vm1042_vm15 = vmand %vm1040_vm12, %vm887_vm3  ;;  %vm1026_vm12 = vcmp.lt.s32.totalorder %v2317_v57, 126  ;;  %v1023_v18 = vpop.permute.xlu0 %1022  ;;  %vm1180_vm3 = vcmask 261120  }
 0x1f9   : > { %1728 = vmatpush2.msk.msra.mxu0 %vm2611_vm2, %v884_v11  ;;  %vm2955_vm2 = vcmp.lt.s32.totalorder %v2317_v57, 112  ;;  %v1074_v57 = vld [vmem:[%s2874_s2 + $0x10] sm:$0xff] }
 0x1fa   : > { %1729 = vmatprep.subr.msk.mxu0 %vm2625_vm0, %v871_v59  ;;  %v1036_v13 = vpop.permute.xlu1 %1035  ;;  %v860_v14 = vsel %vm2955_vm2, %v857_v6, %v855_v30  ;;  %vm2956_vm0 = vmmov %vm2955_vm2 }
 0x1fb   : > { %v1038_v41 = vsel %vm1037_vm7, %v1034_v12, %v1036_v13  ;;  %v1039_v15 = vsel %vm1037_vm7, %v1036_v13, %v1034_v12  ;;  %1730 = vmatpush2.msk.msra.mxu0 %vm2640_vm4, %v870_v5  ;;  %v859_v36 = vsel %vm2956_vm0, %v855_v30, %v857_v6  ;;  %vm2959_vm4 = vcmp.lt.s32.totalorder %v2330_v61, 14  ;;  %v1077_v61 = vld [vmem:[%s2874_s2 + $0x28] sm:$0xff] }
 0x1fc   : > { %1731 = vmatprep.subr.msk.mxu0 %vm2957_vm8, %v860_v14  ;;  %1737 = vmatprep.subr.msk.mxu1 %vm1043_vm1, %v1039_v15 }
 0x1fd   : > { %1732 = vmatpush2.msk.msra.mxu0 %vm2958_vm11, %v859_v36  ;;  %1738 = vmatpush1.msk.msra.mxu1 %vm1042_vm15, %v1038_v41 }
 0x1fe   : > { %1258 = vmatmul.mubr.f32.vlgmr.msra.gmra.mxu0 %v1072_v16  ;;  %v1025_v19 = vpop.permute.xlu1 %1024 }
 0x1ff   : > { %v1027_v20 = vsel %vm1026_vm12, %v1023_v18, %v1025_v19  ;;  %v1028_v21 = vsel %vm1026_vm12, %v1025_v19, %v1023_v18  ;;  %1263 = vmatprep.mubr.f32.mxu0 %v1076_v17 }
 0x200   : > { %1739 = vmatprep.subr.msk.mxu1 %vm2959_vm4, %v1028_v21 }
 0x201   : > { %1740 = vmatpush1.msk.msra.mxu1 %vm2960_vm14, %v1027_v20 }
 0x202   : > { %1264 = vmatmul.mubr.f32.gmra.mxu0 %v1075_v60  ;;  %1668 = vmatmul.mubr.msk.f32.vlgmr.msra.gmra.mxu1 %vm1180_vm3, %v1074_v57  ;;  %v1419_v57 = vld [vmem:[#allocation6] sm:$0xff] }
 0x203   : > { %1269 = vmatprep.mubr.f32.mxu0 %v1079_v62  ;;  %1352 = vmatprep.mubr.f32.mxu1 %v1955_v0  ;;  %v1178_v31 = vpop.permute.xlu0 %1177 }
 0x206   : > { %1270 = vmatmul.mubr.f32.gmra.mxu0 %v1078_v22  ;;  %1669 = vmatmul.mubr.msk.f32.gmra.mxu1 %vm1180_vm3, %v1077_v61  ;;  %v1420_v22 = vld [vmem:[#allocation6 + $0x8] sm:$0xff]  ;;  %v1421_v61 = vld [vmem:[#allocation6 + $0x10] sm:$0xff] }
 0x207   : > { %1275 = vmatprep.mubr.f32.mxu0 %v1082_v23  ;;  %1358 = vmatprep.mubr.f32.mxu1 %v1955_v0  ;;  %v1168_v39 = vpop.permute.xlu0 %1167  ;;  %v1422_v23 = vld [vmem:[#allocation6 + $0x18] sm:$0xff] }
 0x20a   : > { %1276 = vmatmul.mubr.f32.gmra.mxu0 %v1081_v63  ;;  %1670 = vmatmul.mubr.msk.f32.gmra.mxu1 %vm1180_vm3, %v1080_v24 }
 0x20b   : > { %1364 = vmatprep.mubr.f32.mxu1 %v1955_v0  ;;  %v1163_v44 = vpop.permute.xlu0 %1162 }
 0x20c   : > { %v1173_v33 = vpop.permute.xlu1 %1172 }
 0x20e   : > { %1671 = vmatmul.mubr.msk.f32.gmra.mxu1 %vm1180_vm3, %v1083_v25 }
 0x20f   : > { %1523 = vmatprep.mubr.f32.mxu1 %v1955_v0  ;;  %v1391_v12 = vpop.permute.xlu0 %1390 }
 0x210   : > { %v1401_v43 = vpop.permute.xlu1 %1400 }
 0x213   : > { %v1430_v63 = vpop.permute.xlu0 %1429 }
 0x214   : > { %v1396_v1 = vpop.permute.xlu1 %1395 }
 0x218   : > { %v1386_v13 = vpop.permute.xlu1 %1385 }
 0x2be   : > { %v1259_v27 = vpop.f32.mrf.mxu0 }
 0x2bf   : > { %v1260_v8 = vadd.f32 %v1259_v27, %v1163_v44 }
 0x2c0   : > { %v1261_v29 = vpop.f32.mrf.mxu0 }
 0x2c1   : > { %v1262_v6 = vadd.f32 %v1261_v29, %v1163_v44 }
 0x2c2   : > { %v1265_v32 = vpop.f32.mrf.mxu0  ;;  %v1348_v26 = vpop.f32.mrf.mxu1 }
 0x2c3   : > { %v1266_v7 = vadd.f32 %v1265_v32, %v1168_v39  ;;  %v1349_v59 = vadd.f32 %v1348_v26, %v1260_v8 }
 0x2c4   : > { %v1267_v35 = vpop.f32.mrf.mxu0  ;;  %v1350_v37 = vpop.f32.mrf.mxu1 }
 0x2c5   : > { %v1268_v2 = vadd.f32 %v1267_v35, %v1168_v39  ;;  %v1351_v49 = vadd.f32 %v1350_v37, %v1262_v6  ;;  %v1403_v18 = vmul.f32 %v1386_v13, %v1349_v59  ;;  %vm1371_vm15 = vcmp.ge.f32.partialorder %v1349_v59, 0.0 }
 0x2c6   : > { %v1271_v34 = vpop.f32.mrf.mxu0  ;;  %v1354_v38 = vpop.f32.mrf.mxu1 }
 0x2c7   : > { %v1272_v48 = vadd.f32 %v1271_v34, %v1173_v33  ;;  %v1355_v58 = vadd.f32 %v1354_v38, %v1266_v7  ;;  %v1404_v36 = vmul.f32 %v1386_v13, %v1351_v49  ;;  %vm1372_vm6 = vcmp.ge.f32.partialorder %v1351_v49, 0.0 }
 0x2c8   : > { %v1273_v40 = vpop.f32.mrf.mxu0  ;;  %v1356_v42 = vpop.f32.mrf.mxu1  ;;  %v1411_v62 = vsel %vm1371_vm15, %v1349_v59, %v1403_v18 }
 0x2c9   : > { %v1274_v52 = vadd.f32 %v1273_v40, %v1173_v33  ;;  %v1357_v55 = vadd.f32 %v1356_v42, %v1268_v2  ;;  %v1405_v15 = vmul.f32 %v1391_v12, %v1355_v58  ;;  %vm1373_vm1 = vcmp.ge.f32.partialorder %v1355_v58, 0.0 }
 0x2ca   : > { %v1277_v45 = vpop.f32.mrf.mxu0  ;;  %v1360_v47 = vpop.f32.mrf.mxu1  ;;  %v1412_v60 = vsel %vm1372_vm6, %v1351_v49, %v1404_v36 }
 0x2cb   : > { %v1278_v51 = vadd.f32 %v1277_v45, %v1178_v31  ;;  %v1361_v53 = vadd.f32 %v1360_v47, %v1272_v48  ;;  %v1406_v14 = vmul.f32 %v1391_v12, %v1357_v55  ;;  %vm1374_vm9 = vcmp.ge.f32.partialorder %v1357_v55, 0.0 }
 0x2cc   : > { %v1279_v46 = vpop.f32.mrf.mxu0  ;;  %v1362_v50 = vpop.f32.mrf.mxu1  ;;  %v1413_v21 = vsel %vm1373_vm1, %v1355_v58, %v1405_v15 }
 0x2cd   : > { %v1280_v4 = vadd.f32 %v1279_v46, %v1178_v31  ;;  %v1363_v56 = vadd.f32 %v1362_v50, %v1274_v52  ;;  %v1407_v5 = vmul.f32 %v1396_v1, %v1361_v53  ;;  %vm1375_vm7 = vcmp.ge.f32.partialorder %v1361_v53, 0.0  ;;  %v1435_v31 = vpop.permute.xlu1 %1434 }
 0x2ce   : > { %v1366_v54 = vpop.f32.mrf.mxu1  ;;  %v1414_v20 = vsel %vm1374_vm9, %v1357_v55, %v1406_v14 }
 0x2cf   : > { %v1367_v3 = vadd.f32 %v1366_v54, %v1278_v51  ;;  %v1408_v10 = vmul.f32 %v1396_v1, %v1363_v56  ;;  %vm1376_vm13 = vcmp.ge.f32.partialorder %v1363_v56, 0.0  ;;  %v1415_v19 = vsel %vm1375_vm7, %v1361_v53, %v1407_v5 }
 0x2d0   : > { %v1368_v30 = vpop.f32.mrf.mxu1 }
 0x2d1   : > { %v1369_v28 = vadd.f32 %v1368_v30, %v1280_v4  ;;  %v1409_v9 = vmul.f32 %v1401_v43, %v1367_v3  ;;  %vm1377_vm5 = vcmp.ge.f32.partialorder %v1367_v3, 0.0  ;;  %v1416_v17 = vsel %vm1376_vm13, %v1363_v56, %v1408_v10  ;;  %v1445_v40 = vpop.permute.xlu1 %1444 }
 0x2d3   : > { %v1410_v11 = vmul.f32 %v1401_v43, %v1369_v28  ;;  %vm1378_vm10 = vcmp.ge.f32.partialorder %v1369_v28, 0.0  ;;  %v1417_v16 = vsel %vm1377_vm5, %v1367_v3, %v1409_v9 }
 0x2d5   : > { %v1418_v41 = vsel %vm1378_vm10, %v1369_v28, %v1410_v11 }
 0x2d6   : > { %1483 = vmatprep.subr.mxu1 %v1418_v41 }
 0x2d7   : > { %1484 = vmatpush1.msra.mxu1 %v1417_v16 }
 0x2d8   : > { %1485 = vmatprep.subr.mxu1 %v1416_v17 }
 0x2d9   : > { %1486 = vmatpush1.msra.mxu1 %v1415_v19 }
 0x2da   : > { %1487 = vmatprep.subr.mxu1 %v1414_v20 }
 0x2db   : > { %1488 = vmatpush1.msra.mxu1 %v1413_v21 }
 0x2dc   : > { %1489 = vmatprep.subr.mxu1 %v1412_v60 }
 0x2dd   : > { %1490 = vmatpush1.msra.mxu1 %v1411_v62 }
 0x2de   : > { %1672 = vmatmul.mubr.msk.f32.vlgmr.msra.gmra.mxu1 %vm1180_vm3, %v1419_v57 }
 0x2df   : > { %1529 = vmatprep.mubr.f32.mxu1 %v1955_v0 }
 0x2e2   : > { %1673 = vmatmul.mubr.msk.f32.gmra.mxu1 %vm1180_vm3, %v1420_v22 }
 0x2e3   : > { %1535 = vmatprep.mubr.f32.mxu1 %v1955_v0 }
 0x2e6   : > { %1674 = vmatmul.mubr.msk.f32.gmra.mxu1 %vm1180_vm3, %v1421_v61 }
 0x2e7   : > { %1541 = vmatprep.mubr.f32.mxu1 %v1955_v0  ;;  %v1440_v0 = vpop.permute.xlu0 %1439 }
 0x2ea   : > { %1675 = vmatmul.mubr.msk.f32.gmra.mxu1 %vm1180_vm3, %v1422_v23 }
 0x39e   : > { %v1525_v24 = vpop.f32.mrf.mxu1 }
 0x39f   : > { %v1526_v25 = vadd.f32 %v1525_v24, %v1430_v63 }
 0x3a0   : > { %v1527_v27 = vpop.f32.mrf.mxu1 }
 0x3a1   : > { %1548 = vst [vmem:[%s365_s19] sm:$0xff] %v1526_v25  ;;  %v1528_v29 = vadd.f32 %v1527_v27, %v1430_v63 }
 0x3a2   : > { %v1531_v32 = vpop.f32.mrf.mxu1 }
 0x3a3   : > { %1549 = vst [vmem:[%s365_s19 + $0x8] sm:$0xff] %v1528_v29  ;;  %v1532_v26 = vadd.f32 %v1531_v32, %v1435_v31 }
 0x3a4   : > { %v1533_v33 = vpop.f32.mrf.mxu1 }
 0x3a5   : > { %1550 = vst [vmem:[%s365_s19 + $0x10] sm:$0xff] %v1532_v26  ;;  %v1534_v35 = vadd.f32 %v1533_v33, %v1435_v31 }
 0x3a6   : > { %v1537_v37 = vpop.f32.mrf.mxu1 }
 0x3a7   : > { %1551 = vst [vmem:[%s365_s19 + $0x18] sm:$0xff] %v1534_v35  ;;  %v1538_v34 = vadd.f32 %v1537_v37, %v1440_v0 }
 0x3a8   : > { %v1539_v38 = vpop.f32.mrf.mxu1 }
 0x3a9   : > { %1552 = vst [vmem:[%s365_s19 + $0x20] sm:$0xff] %v1538_v34  ;;  %v1540_v39 = vadd.f32 %v1539_v38, %v1440_v0 }
 0x3aa   : > { %v1543_v42 = vpop.f32.mrf.mxu1 }
 0x3ab   : > { %1553 = vst [vmem:[%s365_s19 + $0x28] sm:$0xff] %v1540_v39  ;;  %v1544_v43 = vadd.f32 %v1543_v42, %v1445_v40 }
 0x3ac   : > { %v1545_v45 = vpop.f32.mrf.mxu1 }
 0x3ad   : > { %1554 = vst [vmem:[%s365_s19 + $0x30] sm:$0xff] %v1544_v43  ;;  %v1546_v47 = vadd.f32 %v1545_v45, %v1445_v40 }
 0x3af   : > { %1555 = vst [vmem:[%s365_s19 + $0x38] sm:$0xff] %v1546_v47 }
 0x3b0   : > { %1892 = shalt.err (!%p1889_p0)
}
 0x3b1   : > { %s1893_s23 = scalar_lea.hbm %s2828_s20, 1024  ;;  %s1897_s19 = scalar_lea.hbm %s2881_s9, 2048 }
 0x3b2   : > { %p1894_p5 = scmp.ne.s32.totalorder %s2828_s20, %s1893_s23  ;;  %p1898_p4 = scmp.lt.s32.totalorder %s2828_s20, %s2881_s9 }
 0x3b3   : > { %p1899_p6 = scmp.lt.s32.totalorder %s1897_s19, %s1893_s23 }
 0x3b4   : > { %p1895_p9 = pnand %p1894_p5, %p2961_p11 }
 0x3b5   : > { %p1900_p8 = por %p1899_p6, %p1898_p4 }
 0x3b6   : > { %p1896_p1 = pneg %p1895_p9 }
 0x3b8   : > { %p1901_p3 = pnand %p1900_p8, %p1896_p1 }
 0x3ba   : > { %1904 = shalt.err (!%p1901_p3)
}
 0x3bb   : > { %s1976_s24 = smov 256  }
 0x3bc   : > { %1747 = dma.vmem_to_hbm [thread:$0]  (%p2961_p11), %s2823_s16, 1024, %s2828_s20, %s1557_s15, %s1976_s24, %s1976_s24, %s1961_s28  }
 0x3bd PF: > { %s2962_s27 = sld [smem:[#allocation12_spill]]  ;;  %s1585_s13 = sand.u32 1, %s1935_s30  }
 0x3be   : > { %p2964_p12 = scmp.ge.s32.totalorder %s1947_s12, 2  ;;  %s1586_s22 = scalar_lea.sflag [#allocation5], %s1585_s13 }
 0x3c3   : > { %p2963_p7 = scmp.ne.s32.totalorder %s2962_s27, 0 }
 0x3c5   : > { %p1758_p10 = pnand %p2964_p12, %p2963_p7 }
 0x3c7   : > { %p1759_p2 = pneg %p1758_p10 }
 0x3c9   : > { %1930 = dma.done.wait (%p1759_p2), %s1586_s22, 1024  }
 0x3ca   : > { %1932 = vsyncadd (%p1759_p2), %s1586_s22, 4294966272  ;;  %s2965_s12 = sld [smem:[#allocation13_spill]]  ;;  %s2966_s30 = smov %s1939_s10 }
 0x3cb   : > { %s2967_s10 = smov %s1943_s11  ;;  %s2968_s11 = smov %s2098_s29 }
 0x3d0   : > { %p23_p13 = scmp.ge.s32.totalorder %s2965_s12, 4  }
 0x3d2   :  { %25 = sbr.rel (!%p23_p13) target bundleno = 8 (0x8), region = 105 }
 0x3d7   :  { %1591 = vsyncpa [#allocation4], 1 }
 0x3d8   :  { %1593 = vsyncpa [#allocation4 + $0x1], 1 }
 0x3d9   :  { %1594 = vsyncpa [#allocation7], 1 }
 0x3da   :  { %1595 = vsyncpa [#allocation5], 1 }
 0x3db   :  { %1597 = vsyncpa [#allocation5 + $0x1], 1 }

</bundles_post_ra>
